<compile_context>
chip_gen: v7x
topology: tpu7x:2x2x1
jax: 0.10.0
libtpu: 0.0.40
codegen_flags: <defaults>
</compile_context>

<pallas_src>
from functools import partial

import jax
import jax.numpy as jnp
import numpy as np
from jax import lax
from jax.experimental import pallas as pl
from jax.experimental.pallas import tpu as pltpu


_PAD_NEG = -1e30   # finite stand-in for the maxpool's -inf padding


def _inception_kernel(x_ref, d1_ref, w3r_ref, b3r_ref, w5r_ref, b5r_ref,
                      t3_ref, t5_ref, dp_ref, bout_ref,
                      out_ref, r3pad_ref, r5pad_ref, *, H, W, Cin):
    f32 = jnp.float32
    wf3r = r3pad_ref.shape[1]          # W * f3r
    wf5r = r5pad_ref.shape[1]          # W * f5r

    xin = x_ref[0]                     # (H+2, (W+2)*Cin), 1-px border = _PAD_NEG
    xmid = xin[1:1 + H, :]             # interior rows (border lanes still present)
    xc = xmid[:, Cin:Cin + W * Cin]    # (H, W*Cin) interior pixels only

    # ---- reduce 1x1 convs (block-diagonal weights, lane-packed) ----
    r3 = jnp.maximum(
        jnp.dot(xc, w3r_ref[...], preferred_element_type=f32) + b3r_ref[...], 0.0)
    r5 = jnp.maximum(
        jnp.dot(xc, w5r_ref[...], preferred_element_type=f32) + b5r_ref[...], 0.0)

    # y-zero-padded scratches for the spatial convs (x padding is folded into
    # the block-Toeplitz weights).  Interiors are fully rewritten every grid
    # step; only the tiny never-written border rows are re-zeroed (safe under
    # "parallel" batch semantics on multi-TensorCore chips).
    r3pad_ref[0:1, :] = jnp.zeros((1, wf3r), f32)
    r3pad_ref[H + 1:H + 2, :] = jnp.zeros((1, wf3r), f32)
    r3pad_ref[1:1 + H, :] = r3
    r5pad_ref[0:2, :] = jnp.zeros((2, wf5r), f32)
    r5pad_ref[H + 2:H + 4, :] = jnp.zeros((2, wf5r), f32)
    r5pad_ref[2:2 + H, :] = r5

    # ---- accumulate all four branches into one lane-dense (H, W*Ctot) value ----
    acc = jnp.dot(xc, d1_ref[...], preferred_element_type=f32)            # 1x1 branch

    for ky in range(3):                                                    # 3x3 branch
        acc = acc + jnp.dot(r3pad_ref[ky:ky + H, :], t3_ref[ky],
                            preferred_element_type=f32)
    for ky in range(5):                                                    # 5x5 branch
        acc = acc + jnp.dot(r5pad_ref[ky:ky + H, :], t5_ref[ky],
                            preferred_element_type=f32)

    # 3x3 / stride-1 maxpool: vertical max over 3 row windows, horizontal max
    # over 3 lane windows (the -1e30 border supplies the -inf pad semantics).
    vert = jnp.maximum(jnp.maximum(xin[0:H, :], xmid), xin[2:2 + H, :])
    pooled = jnp.maximum(
        jnp.maximum(vert[:, 0:W * Cin], vert[:, Cin:(W + 1) * Cin]),
        vert[:, 2 * Cin:(W + 2) * Cin])                                    # (H, W*Cin)
    acc = acc + jnp.dot(pooled, dp_ref[...], preferred_element_type=f32)   # pool proj

    # bias + ReLU + ONE lane-dense store (W*Ctot = multiple of 128 lanes)
    out_ref[0] = jnp.maximum(acc + bout_ref[...], 0.0).astype(out_ref.dtype)


def inception_v1_pallas(x_nchw, params):
    (w1, b1, w3r, b3r, w3, b3, w5r, b5r, w5, b5, wp, bp) = params
    B, Cin, H, W = x_nchw.shape
    f1 = w1.shape[1]
    f3r, f3c = w3.shape[1], w3.shape[2]
    f5r, f5c = w5.shape[1], w5.shape[2]
    fp = wp.shape[1]
    ctot = f1 + f3c + f5c + fp
    f32 = jnp.float32

    # ---- lane-packed, border-padded input: (B, H+2, (W+2)*Cin) ----
    x = jnp.transpose(x_nchw, (0, 2, 3, 1)).astype(f32)
    x = jnp.pad(x, ((0, 0), (1, 1), (1, 1), (0, 0)), constant_values=_PAD_NEG)
    x = x.reshape(B, H + 2, (W + 2) * Cin)

    # ---- expand the per-channel weights into lane-packed matmul weights ----
    # (x-axis shifts + zero padding of the 3x3/5x5 convs are folded into
    #  block-Toeplitz matrices; 1x1 convs become block-diagonal matrices.)
    eye_w = jnp.eye(W, dtype=f32)
    o3, o5, opp = f1, f1 + f3c, f1 + f3c + f5c

    def chan_embed(w, off):            # (k, f) -> (k, ctot), placed at channel offset
        return jnp.pad(w.astype(f32), ((0, 0), (off, ctot - off - w.shape[1])))

    d1_big = jnp.kron(eye_w, chan_embed(w1, 0))                    # (W*Cin, W*ctot)
    dp_big = jnp.kron(eye_w, chan_embed(wp, opp))
    w3r_big = jnp.kron(eye_w, w3r.astype(f32))                     # (W*Cin, W*f3r)
    w5r_big = jnp.kron(eye_w, w5r.astype(f32))

    w3_taps = w3.astype(f32).reshape(3, 3, f3r, f3c)
    t3_big = jnp.stack([
        sum(jnp.kron(jnp.eye(W, k=1 - kx, dtype=f32), chan_embed(w3_taps[ky, kx], o3))
            for kx in range(3))
        for ky in range(3)])                                       # (3, W*f3r, W*ctot)

    w5_taps = w5.astype(f32).reshape(5, 5, f5r, f5c)
    t5_big = jnp.stack([
        sum(jnp.kron(jnp.eye(W, k=2 - kx, dtype=f32), chan_embed(w5_taps[ky, kx], o5))
            for kx in range(5))
        for ky in range(5)])                                       # (5, W*f5r, W*ctot)

    b3r_t = jnp.tile(b3r.astype(f32), (1, W))                      # (1, W*f3r)
    b5r_t = jnp.tile(b5r.astype(f32), (1, W))
    bout = jnp.tile(jnp.concatenate([b1, b3, b5, bp], axis=1).astype(f32), (1, W))

    def full_spec(a):
        n = a.ndim
        return pl.BlockSpec(a.shape, lambda b, n=n: (0,) * n)

    kernel = partial(_inception_kernel, H=H, W=W, Cin=Cin)

    grid_spec = pltpu.PrefetchScalarGridSpec(
        num_scalar_prefetch=0,
        grid=(B,),
        in_specs=[
            pl.BlockSpec((1, H + 2, (W + 2) * Cin), lambda b: (b, 0, 0)),
            full_spec(d1_big), full_spec(w3r_big), full_spec(b3r_t),
            full_spec(w5r_big), full_spec(b5r_t),
            full_spec(t3_big), full_spec(t5_big),
            full_spec(dp_big), full_spec(bout),
        ],
        out_specs=pl.BlockSpec((1, H, W * ctot), lambda b: (b, 0, 0)),
        scratch_shapes=[
            pltpu.VMEM((H + 2, W * f3r), jnp.float32),
            pltpu.VMEM((H + 4, W * f5r), jnp.float32),
        ],
    )

    out = pl.pallas_call(
        kernel,
        out_shape=jax.ShapeDtypeStruct((B, H, W * ctot), jnp.float32),
        grid_spec=grid_spec,
        # Batch steps are independent: shard across TensorCores on v7x.
        # (Needs >= 2 grid steps; add an H-strip grid axis here if B can be 1.)
        compiler_params=pltpu.CompilerParams(
            dimension_semantics=("parallel",),
            vmem_limit_bytes=32 * 1024 * 1024),
    )(x, d1_big, w3r_big, b3r_t, w5r_big, b5r_t, t3_big, t5_big, dp_big, bout)

    out = out.reshape(B, H, W, ctot)
    return jnp.transpose(out, (0, 3, 1, 2))        # back to NCHW


# ------------------------ pure-JAX reference (NCHW, like PyTorch) -----------------
def _conv2d_nchw(x, w_oihw, b, pad):
    y = lax.conv_general_dilated(
        x, w_oihw, window_strides=(1, 1),
        padding=[(pad, pad), (pad, pad)],
        dimension_numbers=("NCHW", "OIHW", "NCHW"))
    return y + b.reshape(1, -1, 1, 1)


def _maxpool3_nchw(x):
    return lax.reduce_window(
        x, -jnp.inf, lax.max,
        window_dimensions=(1, 1, 3, 3), window_strides=(1, 1, 1, 1),
        padding=[(0, 0), (0, 0), (1, 1), (1, 1)])


def inception_v1_reference(x, params):
    (w1, b1, w3r, b3r, w3, b3, w5r, b5r, w5, b5, wp, bp) = params
    relu = lambda t: jnp.maximum(t, 0.0)

    def oihw_1x1(w):                       # (Cin, Cout) -> (Cout, Cin, 1, 1)
        return jnp.transpose(w, (1, 0))[:, :, None, None]

    def oihw_kxk(w, k):                    # (k*k, Cin, Cout) -> (Cout, Cin, k, k)
        return jnp.transpose(w.reshape(k, k, w.shape[1], w.shape[2]), (3, 2, 0, 1))

    b_ = lambda b: b.reshape(-1)
    f1_ = relu(_conv2d_nchw(x, oihw_1x1(w1), b_(b1), 0))
    r3_ = relu(_conv2d_nchw(x, oihw_1x1(w3r), b_(b3r), 0))
    f2_ = relu(_conv2d_nchw(r3_, oihw_kxk(w3, 3), b_(b3), 1))
    r5_ = relu(_conv2d_nchw(x, oihw_1x1(w5r), b_(b5r), 0))
    f3_ = relu(_conv2d_nchw(r5_, oihw_kxk(w5, 5), b_(b5), 2))
    mp_ = _maxpool3_nchw(x)
    f4_ = relu(_conv2d_nchw(mp_, oihw_1x1(wp), b_(bp), 0))
    return jnp.concatenate([f1_, f2_, f3_, f4_], axis=1)


if __name__ == "__main__":
    # small shapes consistent with the module: x is (B, C, H, W)
    B, Cin, H, W = 2, 4, 16, 16
    f_1x1, f_3x3, f_5x5, f_mp = 8, (4, 8), (2, 8), 8

    key = jax.random.PRNGKey(0)
    ks = jax.random.split(key, 13)
    x = jax.random.normal(ks[0], (B, Cin, H, W), jnp.float32)

    def w(k, shape):
        return jax.random.normal(k, shape, jnp.float32) * 0.1

    def bias(k, n):
        return jax.random.normal(k, (1, n), jnp.float32) * 0.01

    params = (
        w(ks[1], (Cin, f_1x1)),        bias(ks[2], f_1x1),          # 1x1 branch
        w(ks[3], (Cin, f_3x3[0])),     bias(ks[4], f_3x3[0]),       # 3x3 reduce
        w(ks[5], (9, f_3x3[0], f_3x3[1])),  bias(ks[6], f_3x3[1]),  # 3x3 conv (taps, Cin, Cout)
        w(ks[7], (Cin, f_5x5[0])),     bias(ks[8], f_5x5[0]),       # 5x5 reduce
        w(ks[9], (25, f_5x5[0], f_5x5[1])), bias(ks[10], f_5x5[1]), # 5x5 conv
        w(ks[11], (Cin, f_mp)),        bias(ks[12], f_mp),          # pool-proj 1x1
    )

    fwd = jax.jit(inception_v1_pallas)
    out = jax.block_until_ready(fwd(x, params))
    ref = jax.block_until_ready(inception_v1_reference(x, params))

    expected_c = f_1x1 + f_3x3[1] + f_5x5[1] + f_mp
    assert out.shape == (B, expected_c, H, W), out.shape
    np.testing.assert_allclose(np.asarray(out), np.asarray(ref), rtol=1e-4, atol=1e-4)
    print("KERNEL_OK")
</pallas_src>

<mosaic_0001>
module attributes {stable_mosaic.version = 11 : i64} {
  func.func @_inception_kernel(%arg0: i32, %arg1: memref<1x18x72xf32, #tpu.memory_space<vmem>>, %arg2: memref<64x512xf32, #tpu.memory_space<vmem>>, %arg3: memref<64x64xf32, #tpu.memory_space<vmem>>, %arg4: memref<1x64xf32, #tpu.memory_space<vmem>>, %arg5: memref<64x32xf32, #tpu.memory_space<vmem>>, %arg6: memref<1x32xf32, #tpu.memory_space<vmem>>, %arg7: memref<3x64x512xf32, #tpu.memory_space<vmem>>, %arg8: memref<5x32x512xf32, #tpu.memory_space<vmem>>, %arg9: memref<64x512xf32, #tpu.memory_space<vmem>>, %arg10: memref<1x512xf32, #tpu.memory_space<vmem>>, %arg11: memref<1x16x512xf32, #tpu.memory_space<vmem>>, %arg12: memref<18x64xf32, #tpu.memory_space<vmem>>, %arg13: memref<20x32xf32, #tpu.memory_space<vmem>>) attributes {dimension_semantics = [#tpu.dimension_semantics<parallel>], iteration_bounds = array<i64: 2>, scalar_prefetch = 0 : i64, scratch_operands = 2 : i64, tpu.core_type = #tpu.core_type<tc>, window_params = [{transform_indices = @transform_0, window_bounds = array<i64: 1, 18, 72>}, {pipeline_mode = #tpu.pipeline_mode<synchronous>, transform_indices = @transform_1, window_bounds = array<i64: 64, 512>}, {pipeline_mode = #tpu.pipeline_mode<synchronous>, transform_indices = @transform_2, window_bounds = array<i64: 64, 64>}, {pipeline_mode = #tpu.pipeline_mode<synchronous>, transform_indices = @transform_3, window_bounds = array<i64: 1, 64>}, {pipeline_mode = #tpu.pipeline_mode<synchronous>, transform_indices = @transform_4, window_bounds = array<i64: 64, 32>}, {pipeline_mode = #tpu.pipeline_mode<synchronous>, transform_indices = @transform_5, window_bounds = array<i64: 1, 32>}, {pipeline_mode = #tpu.pipeline_mode<synchronous>, transform_indices = @transform_6, window_bounds = array<i64: 3, 64, 512>}, {pipeline_mode = #tpu.pipeline_mode<synchronous>, transform_indices = @transform_7, window_bounds = array<i64: 5, 32, 512>}, {pipeline_mode = #tpu.pipeline_mode<synchronous>, transform_indices = @transform_8, window_bounds = array<i64: 64, 512>}, {pipeline_mode = #tpu.pipeline_mode<synchronous>, transform_indices = @transform_9, window_bounds = array<i64: 1, 512>}, {transform_indices = @transform_10, window_bounds = array<i64: 1, 16, 512>}]} {
    %c0 = arith.constant 0 : index
    %c0_0 = arith.constant 0 : index
    %c0_1 = arith.constant 0 : index
    %0 = vector.load %arg1[%c0, %c0_0, %c0_1] : memref<1x18x72xf32, #tpu.memory_space<vmem>>, vector<1x18x72xf32>
    %1 = vector.shape_cast %0 : vector<1x18x72xf32> to vector<18x72xf32>
    %2 = vector.extract_strided_slice %1 {offsets = [1, 0], sizes = [16, 72], strides = [1, 1]} : vector<18x72xf32> to vector<16x72xf32>
    %3 = vector.extract_strided_slice %2 {offsets = [0, 4], sizes = [16, 64], strides = [1, 1]} : vector<16x72xf32> to vector<16x64xf32>
    %c0_2 = arith.constant 0 : index
    %c0_3 = arith.constant 0 : index
    %4 = vector.load %arg3[%c0_2, %c0_3] : memref<64x64xf32, #tpu.memory_space<vmem>>, vector<64x64xf32>
    %cst = arith.constant dense<0.000000e+00> : vector<16x64xf32>
    %5 = tpu.matmul %3, %4, %cst {dimension_numbers = #tpu.dot_dimension_numbers<[1], [0], [0], [1], [0, 0, 1, 1], [], []>} : vector<16x64xf32>, vector<64x64xf32>, vector<16x64xf32> -> vector<16x64xf32>
    %c0_4 = arith.constant 0 : index
    %c0_5 = arith.constant 0 : index
    %6 = vector.load %arg4[%c0_4, %c0_5] : memref<1x64xf32, #tpu.memory_space<vmem>>, vector<1x64xf32>
    %7 = vector.broadcast %6 : vector<1x64xf32> to vector<16x64xf32>
    %8 = arith.addf %5, %7 : vector<16x64xf32>
    %cst_6 = arith.constant 0.000000e+00 : f32
    %9 = vector.broadcast %cst_6 : f32 to vector<16x64xf32>
    %10 = arith.maximumf %8, %9 : vector<16x64xf32>
    %c0_7 = arith.constant 0 : index
    %c0_8 = arith.constant 0 : index
    %11 = vector.load %arg5[%c0_7, %c0_8] : memref<64x32xf32, #tpu.memory_space<vmem>>, vector<64x32xf32>
    %cst_9 = arith.constant dense<0.000000e+00> : vector<16x32xf32>
    %12 = tpu.matmul %3, %11, %cst_9 {dimension_numbers = #tpu.dot_dimension_numbers<[1], [0], [0], [1], [0, 0, 1, 1], [], []>} : vector<16x64xf32>, vector<64x32xf32>, vector<16x32xf32> -> vector<16x32xf32>
    %c0_10 = arith.constant 0 : index
    %c0_11 = arith.constant 0 : index
    %13 = vector.load %arg6[%c0_10, %c0_11] : memref<1x32xf32, #tpu.memory_space<vmem>>, vector<1x32xf32>
    %14 = vector.broadcast %13 : vector<1x32xf32> to vector<16x32xf32>
    %15 = arith.addf %12, %14 : vector<16x32xf32>
    %cst_12 = arith.constant 0.000000e+00 : f32
    %16 = vector.broadcast %cst_12 : f32 to vector<16x32xf32>
    %17 = arith.maximumf %15, %16 : vector<16x32xf32>
    %cst_13 = arith.constant 0.000000e+00 : f32
    %18 = vector.broadcast %cst_13 : f32 to vector<1x64xf32>
    %c0_14 = arith.constant 0 : index
    %c0_15 = arith.constant 0 : index
    %19 = vector.load %arg12[%c0_14, %c0_15] : memref<18x64xf32, #tpu.memory_space<vmem>>, vector<1x64xf32>
    tpu.vector_store %arg12[%c0_14, %c0_15], %18 {strides = array<i32>} : memref<18x64xf32, #tpu.memory_space<vmem>>, vector<1x64xf32>,
    %cst_16 = arith.constant 0.000000e+00 : f32
    %20 = vector.broadcast %cst_16 : f32 to vector<1x64xf32>
    %c17 = arith.constant 17 : index
    %c0_17 = arith.constant 0 : index
    %21 = vector.load %arg12[%c17, %c0_17] : memref<18x64xf32, #tpu.memory_space<vmem>>, vector<1x64xf32>
    tpu.vector_store %arg12[%c17, %c0_17], %20 {strides = array<i32>} : memref<18x64xf32, #tpu.memory_space<vmem>>, vector<1x64xf32>,
    %c1 = arith.constant 1 : index
    %c0_18 = arith.constant 0 : index
    %22 = vector.load %arg12[%c1, %c0_18] : memref<18x64xf32, #tpu.memory_space<vmem>>, vector<16x64xf32>
    tpu.vector_store %arg12[%c1, %c0_18], %10 {strides = array<i32>} : memref<18x64xf32, #tpu.memory_space<vmem>>, vector<16x64xf32>,
    %cst_19 = arith.constant 0.000000e+00 : f32
    %23 = vector.broadcast %cst_19 : f32 to vector<2x32xf32>
    %c0_20 = arith.constant 0 : index
    %c0_21 = arith.constant 0 : index
    %24 = vector.load %arg13[%c0_20, %c0_21] : memref<20x32xf32, #tpu.memory_space<vmem>>, vector<2x32xf32>
    tpu.vector_store %arg13[%c0_20, %c0_21], %23 {strides = array<i32>} : memref<20x32xf32, #tpu.memory_space<vmem>>, vector<2x32xf32>,
    %cst_22 = arith.constant 0.000000e+00 : f32
    %25 = vector.broadcast %cst_22 : f32 to vector<2x32xf32>
    %c18 = arith.constant 18 : index
    %c0_23 = arith.constant 0 : index
    %26 = vector.load %arg13[%c18, %c0_23] : memref<20x32xf32, #tpu.memory_space<vmem>>, vector<2x32xf32>
    tpu.vector_store %arg13[%c18, %c0_23], %25 {strides = array<i32>} : memref<20x32xf32, #tpu.memory_space<vmem>>, vector<2x32xf32>,
    %c2 = arith.constant 2 : index
    %c0_24 = arith.constant 0 : index
    %27 = vector.load %arg13[%c2, %c0_24] : memref<20x32xf32, #tpu.memory_space<vmem>>, vector<16x32xf32>
    tpu.vector_store %arg13[%c2, %c0_24], %17 {strides = array<i32>} : memref<20x32xf32, #tpu.memory_space<vmem>>, vector<16x32xf32>,
    %c0_25 = arith.constant 0 : index
    %c0_26 = arith.constant 0 : index
    %28 = vector.load %arg2[%c0_25, %c0_26] : memref<64x512xf32, #tpu.memory_space<vmem>>, vector<64x512xf32>
    %cst_27 = arith.constant dense<0.000000e+00> : vector<16x512xf32>
    %29 = tpu.matmul %3, %28, %cst_27 {dimension_numbers = #tpu.dot_dimension_numbers<[1], [0], [0], [1], [0, 0, 1, 1], [], []>} : vector<16x64xf32>, vector<64x512xf32>, vector<16x512xf32> -> vector<16x512xf32>
    %c0_28 = arith.constant 0 : index
    %c0_29 = arith.constant 0 : index
    %30 = vector.load %arg12[%c0_28, %c0_29] : memref<18x64xf32, #tpu.memory_space<vmem>>, vector<16x64xf32>
    %c0_30 = arith.constant 0 : index
    %c0_31 = arith.constant 0 : index
    %c0_32 = arith.constant 0 : index
    %31 = vector.load %arg7[%c0_30, %c0_31, %c0_32] : memref<3x64x512xf32, #tpu.memory_space<vmem>>, vector<1x64x512xf32>
    %32 = vector.shape_cast %31 : vector<1x64x512xf32> to vector<64x512xf32>
    %cst_33 = arith.constant dense<0.000000e+00> : vector<16x512xf32>
    %33 = tpu.matmul %30, %32, %cst_33 {dimension_numbers = #tpu.dot_dimension_numbers<[1], [0], [0], [1], [0, 0, 1, 1], [], []>} : vector<16x64xf32>, vector<64x512xf32>, vector<16x512xf32> -> vector<16x512xf32>
    %34 = arith.addf %29, %33 : vector<16x512xf32>
    %c1_34 = arith.constant 1 : index
    %c0_35 = arith.constant 0 : index
    %35 = vector.load %arg12[%c1_34, %c0_35] : memref<18x64xf32, #tpu.memory_space<vmem>>, vector<16x64xf32>
    %c1_36 = arith.constant 1 : index
    %c0_37 = arith.constant 0 : index
    %c0_38 = arith.constant 0 : index
    %36 = vector.load %arg7[%c1_36, %c0_37, %c0_38] : memref<3x64x512xf32, #tpu.memory_space<vmem>>, vector<1x64x512xf32>
    %37 = vector.shape_cast %36 : vector<1x64x512xf32> to vector<64x512xf32>
    %cst_39 = arith.constant dense<0.000000e+00> : vector<16x512xf32>
    %38 = tpu.matmul %35, %37, %cst_39 {dimension_numbers = #tpu.dot_dimension_numbers<[1], [0], [0], [1], [0, 0, 1, 1], [], []>} : vector<16x64xf32>, vector<64x512xf32>, vector<16x512xf32> -> vector<16x512xf32>
    %39 = arith.addf %34, %38 : vector<16x512xf32>
    %c2_40 = arith.constant 2 : index
    %c0_41 = arith.constant 0 : index
    %40 = vector.load %arg12[%c2_40, %c0_41] : memref<18x64xf32, #tpu.memory_space<vmem>>, vector<16x64xf32>
    %c2_42 = arith.constant 2 : index
    %c0_43 = arith.constant 0 : index
    %c0_44 = arith.constant 0 : index
    %41 = vector.load %arg7[%c2_42, %c0_43, %c0_44] : memref<3x64x512xf32, #tpu.memory_space<vmem>>, vector<1x64x512xf32>
    %42 = vector.shape_cast %41 : vector<1x64x512xf32> to vector<64x512xf32>
    %cst_45 = arith.constant dense<0.000000e+00> : vector<16x512xf32>
    %43 = tpu.matmul %40, %42, %cst_45 {dimension_numbers = #tpu.dot_dimension_numbers<[1], [0], [0], [1], [0, 0, 1, 1], [], []>} : vector<16x64xf32>, vector<64x512xf32>, vector<16x512xf32> -> vector<16x512xf32>
    %44 = arith.addf %39, %43 : vector<16x512xf32>
    %c0_46 = arith.constant 0 : index
    %c0_47 = arith.constant 0 : index
    %45 = vector.load %arg13[%c0_46, %c0_47] : memref<20x32xf32, #tpu.memory_space<vmem>>, vector<16x32xf32>
    %c0_48 = arith.constant 0 : index
    %c0_49 = arith.constant 0 : index
    %c0_50 = arith.constant 0 : index
    %46 = vector.load %arg8[%c0_48, %c0_49, %c0_50] : memref<5x32x512xf32, #tpu.memory_space<vmem>>, vector<1x32x512xf32>
    %47 = vector.shape_cast %46 : vector<1x32x512xf32> to vector<32x512xf32>
    %cst_51 = arith.constant dense<0.000000e+00> : vector<16x512xf32>
    %48 = tpu.matmul %45, %47, %cst_51 {dimension_numbers = #tpu.dot_dimension_numbers<[1], [0], [0], [1], [0, 0, 1, 1], [], []>} : vector<16x32xf32>, vector<32x512xf32>, vector<16x512xf32> -> vector<16x512xf32>
    %49 = arith.addf %44, %48 : vector<16x512xf32>
    %c1_52 = arith.constant 1 : index
    %c0_53 = arith.constant 0 : index
    %50 = vector.load %arg13[%c1_52, %c0_53] : memref<20x32xf32, #tpu.memory_space<vmem>>, vector<16x32xf32>
    %c1_54 = arith.constant 1 : index
    %c0_55 = arith.constant 0 : index
    %c0_56 = arith.constant 0 : index
    %51 = vector.load %arg8[%c1_54, %c0_55, %c0_56] : memref<5x32x512xf32, #tpu.memory_space<vmem>>, vector<1x32x512xf32>
    %52 = vector.shape_cast %51 : vector<1x32x512xf32> to vector<32x512xf32>
    %cst_57 = arith.constant dense<0.000000e+00> : vector<16x512xf32>
    %53 = tpu.matmul %50, %52, %cst_57 {dimension_numbers = #tpu.dot_dimension_numbers<[1], [0], [0], [1], [0, 0, 1, 1], [], []>} : vector<16x32xf32>, vector<32x512xf32>, vector<16x512xf32> -> vector<16x512xf32>
    %54 = arith.addf %49, %53 : vector<16x512xf32>
    %c2_58 = arith.constant 2 : index
    %c0_59 = arith.constant 0 : index
    %55 = vector.load %arg13[%c2_58, %c0_59] : memref<20x32xf32, #tpu.memory_space<vmem>>, vector<16x32xf32>
    %c2_60 = arith.constant 2 : index
    %c0_61 = arith.constant 0 : index
    %c0_62 = arith.constant 0 : index
    %56 = vector.load %arg8[%c2_60, %c0_61, %c0_62] : memref<5x32x512xf32, #tpu.memory_space<vmem>>, vector<1x32x512xf32>
    %57 = vector.shape_cast %56 : vector<1x32x512xf32> to vector<32x512xf32>
    %cst_63 = arith.constant dense<0.000000e+00> : vector<16x512xf32>
    %58 = tpu.matmul %55, %57, %cst_63 {dimension_numbers = #tpu.dot_dimension_numbers<[1], [0], [0], [1], [0, 0, 1, 1], [], []>} : vector<16x32xf32>, vector<32x512xf32>, vector<16x512xf32> -> vector<16x512xf32>
    %59 = arith.addf %54, %58 : vector<16x512xf32>
    %c3 = arith.constant 3 : index
    %c0_64 = arith.constant 0 : index
    %60 = vector.load %arg13[%c3, %c0_64] : memref<20x32xf32, #tpu.memory_space<vmem>>, vector<16x32xf32>
    %c3_65 = arith.constant 3 : index
    %c0_66 = arith.constant 0 : index
    %c0_67 = arith.constant 0 : index
    %61 = vector.load %arg8[%c3_65, %c0_66, %c0_67] : memref<5x32x512xf32, #tpu.memory_space<vmem>>, vector<1x32x512xf32>
    %62 = vector.shape_cast %61 : vector<1x32x512xf32> to vector<32x512xf32>
    %cst_68 = arith.constant dense<0.000000e+00> : vector<16x512xf32>
    %63 = tpu.matmul %60, %62, %cst_68 {dimension_numbers = #tpu.dot_dimension_numbers<[1], [0], [0], [1], [0, 0, 1, 1], [], []>} : vector<16x32xf32>, vector<32x512xf32>, vector<16x512xf32> -> vector<16x512xf32>
    %64 = arith.addf %59, %63 : vector<16x512xf32>
    %c4 = arith.constant 4 : index
    %c0_69 = arith.constant 0 : index
    %65 = vector.load %arg13[%c4, %c0_69] : memref<20x32xf32, #tpu.memory_space<vmem>>, vector<16x32xf32>
    %c4_70 = arith.constant 4 : index
    %c0_71 = arith.constant 0 : index
    %c0_72 = arith.constant 0 : index
    %66 = vector.load %arg8[%c4_70, %c0_71, %c0_72] : memref<5x32x512xf32, #tpu.memory_space<vmem>>, vector<1x32x512xf32>
    %67 = vector.shape_cast %66 : vector<1x32x512xf32> to vector<32x512xf32>
    %cst_73 = arith.constant dense<0.000000e+00> : vector<16x512xf32>
    %68 = tpu.matmul %65, %67, %cst_73 {dimension_numbers = #tpu.dot_dimension_numbers<[1], [0], [0], [1], [0, 0, 1, 1], [], []>} : vector<16x32xf32>, vector<32x512xf32>, vector<16x512xf32> -> vector<16x512xf32>
    %69 = arith.addf %64, %68 : vector<16x512xf32>
    %70 = vector.extract_strided_slice %1 {offsets = [0, 0], sizes = [16, 72], strides = [1, 1]} : vector<18x72xf32> to vector<16x72xf32>
    %71 = arith.maximumf %70, %2 : vector<16x72xf32>
    %72 = vector.extract_strided_slice %1 {offsets = [2, 0], sizes = [16, 72], strides = [1, 1]} : vector<18x72xf32> to vector<16x72xf32>
    %73 = arith.maximumf %71, %72 : vector<16x72xf32>
    %74 = vector.extract_strided_slice %73 {offsets = [0, 0], sizes = [16, 64], strides = [1, 1]} : vector<16x72xf32> to vector<16x64xf32>
    %75 = vector.extract_strided_slice %73 {offsets = [0, 4], sizes = [16, 64], strides = [1, 1]} : vector<16x72xf32> to vector<16x64xf32>
    %76 = arith.maximumf %74, %75 : vector<16x64xf32>
    %77 = vector.extract_strided_slice %73 {offsets = [0, 8], sizes = [16, 64], strides = [1, 1]} : vector<16x72xf32> to vector<16x64xf32>
    %78 = arith.maximumf %76, %77 : vector<16x64xf32>
    %c0_74 = arith.constant 0 : index
    %c0_75 = arith.constant 0 : index
    %79 = vector.load %arg9[%c0_74, %c0_75] : memref<64x512xf32, #tpu.memory_space<vmem>>, vector<64x512xf32>
    %cst_76 = arith.constant dense<0.000000e+00> : vector<16x512xf32>
    %80 = tpu.matmul %78, %79, %cst_76 {dimension_numbers = #tpu.dot_dimension_numbers<[1], [0], [0], [1], [0, 0, 1, 1], [], []>} : vector<16x64xf32>, vector<64x512xf32>, vector<16x512xf32> -> vector<16x512xf32>
    %81 = arith.addf %69, %80 : vector<16x512xf32>
    %c0_77 = arith.constant 0 : index
    %c0_78 = arith.constant 0 : index
    %82 = vector.load %arg10[%c0_77, %c0_78] : memref<1x512xf32, #tpu.memory_space<vmem>>, vector<1x512xf32>
    %83 = vector.broadcast %82 : vector<1x512xf32> to vector<16x512xf32>
    %84 = arith.addf %81, %83 : vector<16x512xf32>
    %cst_79 = arith.constant 0.000000e+00 : f32
    %85 = vector.broadcast %cst_79 : f32 to vector<16x512xf32>
    %86 = arith.maximumf %84, %85 : vector<16x512xf32>
    %c0_80 = arith.constant 0 : index
    %c0_81 = arith.constant 0 : index
    %c0_82 = arith.constant 0 : index
    %87 = vector.load %arg11[%c0_80, %c0_81, %c0_82] : memref<1x16x512xf32, #tpu.memory_space<vmem>>, vector<1x16x512xf32>
    %88 = vector.shape_cast %87 : vector<1x16x512xf32> to vector<16x512xf32>
    %89 = vector.shape_cast %86 : vector<16x512xf32> to vector<1x16x512xf32>
    tpu.vector_store %arg11[%c0_80, %c0_81, %c0_82], %89 {strides = array<i32>} : memref<1x16x512xf32, #tpu.memory_space<vmem>>, vector<1x16x512xf32>,
    return
  }
  func.func @transform_0(%arg0: i32) -> (i32, i32, i32) {
    %c0_i32 = arith.constant 0 : i32
    %c0_i32_0 = arith.constant 0 : i32
    %c0_i32_1 = arith.constant 0 : i32
    return %arg0, %c0_i32, %c0_i32_0 : i32, i32, i32
  }
  func.func @transform_1(%arg0: i32) -> (i32, i32) {
    %c0_i32 = arith.constant 0 : i32
    %c0_i32_0 = arith.constant 0 : i32
    %c0_i32_1 = arith.constant 0 : i32
    return %c0_i32, %c0_i32_0 : i32, i32
  }
  func.func @transform_2(%arg0: i32) -> (i32, i32) {
    %c0_i32 = arith.constant 0 : i32
    %c0_i32_0 = arith.constant 0 : i32
    %c0_i32_1 = arith.constant 0 : i32
    return %c0_i32, %c0_i32_0 : i32, i32
  }
  func.func @transform_3(%arg0: i32) -> (i32, i32) {
    %c0_i32 = arith.constant 0 : i32
    %c0_i32_0 = arith.constant 0 : i32
    %c0_i32_1 = arith.constant 0 : i32
    return %c0_i32, %c0_i32_0 : i32, i32
  }
  func.func @transform_4(%arg0: i32) -> (i32, i32) {
    %c0_i32 = arith.constant 0 : i32
    %c0_i32_0 = arith.constant 0 : i32
    %c0_i32_1 = arith.constant 0 : i32
    return %c0_i32, %c0_i32_0 : i32, i32
  }
  func.func @transform_5(%arg0: i32) -> (i32, i32) {
    %c0_i32 = arith.constant 0 : i32
    %c0_i32_0 = arith.constant 0 : i32
    %c0_i32_1 = arith.constant 0 : i32
    return %c0_i32, %c0_i32_0 : i32, i32
  }
  func.func @transform_6(%arg0: i32) -> (i32, i32, i32) {
    %c0_i32 = arith.constant 0 : i32
    %c0_i32_0 = arith.constant 0 : i32
    %c0_i32_1 = arith.constant 0 : i32
    %c0_i32_2 = arith.constant 0 : i32
    return %c0_i32, %c0_i32_0, %c0_i32_1 : i32, i32, i32
  }
  func.func @transform_7(%arg0: i32) -> (i32, i32, i32) {
    %c0_i32 = arith.constant 0 : i32
    %c0_i32_0 = arith.constant 0 : i32
    %c0_i32_1 = arith.constant 0 : i32
    %c0_i32_2 = arith.constant 0 : i32
    return %c0_i32, %c0_i32_0, %c0_i32_1 : i32, i32, i32
  }
  func.func @transform_8(%arg0: i32) -> (i32, i32) {
    %c0_i32 = arith.constant 0 : i32
    %c0_i32_0 = arith.constant 0 : i32
    %c0_i32_1 = arith.constant 0 : i32
    return %c0_i32, %c0_i32_0 : i32, i32
  }
  func.func @transform_9(%arg0: i32) -> (i32, i32) {
    %c0_i32 = arith.constant 0 : i32
    %c0_i32_0 = arith.constant 0 : i32
    %c0_i32_1 = arith.constant 0 : i32
    return %c0_i32, %c0_i32_0 : i32, i32
  }
  func.func @transform_10(%arg0: i32) -> (i32, i32, i32) {
    %c0_i32 = arith.constant 0 : i32
    %c0_i32_0 = arith.constant 0 : i32
    %c0_i32_1 = arith.constant 0 : i32
    return %arg0, %c0_i32, %c0_i32_0 : i32, i32, i32
  }
}

</mosaic_0001>

<bundles_post_ra>
// kernel: inception_v1_pallas.1
= control target key start
LH: loop header
LB: loop body
LE: loop exit
PB: predicated region body
PF: predicated region fallthrough
CT: control target
= control target key end

     0   :  { %s3294_s13 = smov 0   ;;  %s4221_s0 = inlined_call_operand.vmem [shape: f32[2,18,72], index: 0, kind: input, shape index: {}]   ;;  %s4222_s1 = inlined_call_operand.vmem [shape: f32[64,512], index: 1, kind: input, shape index: {}]   ;;  %s4223_s2 = inlined_call_operand.vmem [shape: f32[64,64], index: 2, kind: input, shape index: {}]   ;;  %s4224_s3 = inlined_call_operand.vmem [shape: f32[1,64], index: 3, kind: input, shape index: {}]   ;;  %s4225_s4 = inlined_call_operand.vmem [shape: f32[64,32], index: 4, kind: input, shape index: {}]   ;;  %s4226_s5 = inlined_call_operand.vmem [shape: f32[1,32], index: 5, kind: input, shape index: {}]   ;;  %s4227_s6 = inlined_call_operand.vmem [shape: f32[3,64,512], index: 6, kind: input, shape index: {}]   ;;  %s4228_s7 = inlined_call_operand.vmem [shape: f32[5,32,512], index: 7, kind: input, shape index: {}]   ;;  %s4229_s8 = inlined_call_operand.vmem [shape: f32[64,512], index: 8, kind: input, shape index: {}]   ;;  %s4230_s9 = inlined_call_operand.vmem [shape: f32[1,512], index: 9, kind: input, shape index: {}]   ;;  %s4231_s10 = inlined_call_operand.vmem [shape: f32[2,16,512], index: 10, kind: output, shape index: {}]  }
   0x1 LB: > { %s2629_s14 = sadd.s32 4294967295, %s3234_s13   ;;  %p2633_p0 = scmp.ge.s32.totalorder %s3234_s13, 1  ;;  %s3234_s13 = sphi %s3294_s13, %s20_s13  }
   0x2   : > { %p312_p1 = scmp.lt.s32.totalorder %s3234_s13, 3 }
   0x4   : > { %p313_p2 = pnand %p2633_p0, %p312_p1 }
   0x5   : > { %p350_p3 = scmp.lt.s32.totalorder (!%p313_p2), %s2629_s14, 1  ;;  %v363_v0 = vld [vmem:[%s4223_s2] sm:$0xff] (!%p313_p2)  ;;  %v364_v1 = vld [vmem:[%s4223_s2 + $0x8] sm:$0xff] (!%p313_p2)  ;;  %v365_v5 = vld [vmem:[%s4223_s2 + $0x10] sm:$0xff] (!%p313_p2)  ;;  %vm381_vm0 = vcmask (!%p313_p2), 1046528   ;;  %vm2300_vm1 = vcmask (!%p313_p2), 1045504  }
   0x6   : > { %316 = sbr.rel (%p313_p2) target bundleno = 692 (0x2b4), region = 60  ;;  %v2872_v2 = vpack.c.bf16 (!%p313_p2), %v364_v1, %v363_v0  ;;  %v473_v3 = vld [vmem:[%s4225_s4] sm:$0xff] (!%p313_p2)  ;;  %v474_v4 = vld [vmem:[%s4225_s4 + $0x8] sm:$0xff] (!%p313_p2)  ;;  %v366_v7 = vld [vmem:[%s4223_s2 + $0x18] sm:$0xff] (!%p313_p2)  ;;  %s3237_s24 = smov (!%p313_p2), 120   ;;  %vm391_vm2 = vcmask (!%p313_p2), 523264  }
   0x7   : > { %v2888_v6 = vpack.c.bf16 (!%p313_p2), %v474_v4, %v473_v3  ;;  %v475_v8 = vld [vmem:[%s4225_s4 + $0x10] sm:$0xff] (!%p313_p2)  ;;  %v476_v9 = vld [vmem:[%s4225_s4 + $0x18] sm:$0xff] (!%p313_p2)  ;;  %v2876_v10 = vpack.c.bf16 (!%p313_p2), %v366_v7, %v365_v5  ;;  %v367_v12 = vld [vmem:[%s4223_s2 + $0x20] sm:$0xff] (!%p313_p2)  ;;  %vm565_vm3 = vcmask (!%p313_p2), 516096   ;;  %vm570_vm4 = vcmask (!%p313_p2), 254976  }
   0x8   : > { %2873 = vmatprep.subr.bf16.mxu0 (!%p313_p2), %v2872_v2  ;;  %v2892_v11 = vpack.c.bf16 (!%p313_p2), %v476_v9, %v475_v8  ;;  %v368_v13 = vld [vmem:[%s4223_s2 + $0x28] sm:$0xff] (!%p313_p2)  ;;  %v477_v14 = vld [vmem:[%s4225_s4 + $0x20] sm:$0xff] (!%p313_p2)  ;;  %v369_v17 = vld [vmem:[%s4223_s2 + $0x30] sm:$0xff] (!%p313_p2)  ;;  %vm573_vm5 = vcmask (!%p313_p2), 261120  }
   0x9   : > { %2889 = vmatprep.subr.bf16.mxu1 (!%p313_p2), %v2888_v6  ;;  %2875 = vmatpush3.bf16.msra.mxu0 (!%p313_p2), %v2872_v2  ;;  %v478_v15 = vld [vmem:[%s4225_s4 + $0x28] sm:$0xff] (!%p313_p2)  ;;  %v2880_v16 = vpack.c.bf16 (!%p313_p2), %v368_v13, %v367_v12  ;;  %v370_v19 = vld [vmem:[%s4223_s2 + $0x38] sm:$0xff] (!%p313_p2)  ;;  %v479_v20 = vld [vmem:[%s4225_s4 + $0x30] sm:$0xff] (!%p313_p2) }
   0xa   : > { %2891 = vmatpush3.bf16.msra.mxu1 (!%p313_p2), %v2888_v6  ;;  %2877 = vmatprep.subr.bf16.mxu0 (!%p313_p2), %v2876_v10  ;;  %v2896_v18 = vpack.c.bf16 (!%p313_p2), %v478_v15, %v477_v14  ;;  %v480_v21 = vld [vmem:[%s4225_s4 + $0x38] sm:$0xff] (!%p313_p2)  ;;  %v2884_v30 = vpack.c.bf16 (!%p313_p2), %v370_v19, %v369_v17  ;;  %v611_v34 = vld [vmem:[%s4227_s6 + $0x8] sm:$0xff] (!%p313_p2)  ;;  %v610_v44 = vld [vmem:[%s4227_s6] sm:$0xff] (!%p313_p2)  ;;  %v3238_v15 = vmov (!%p313_p2), 0.0  }
   0xb   : > { %2893 = vmatprep.subr.bf16.mxu1 (!%p313_p2), %v2892_v11  ;;  %v2900_v33 = vpack.c.bf16 (!%p313_p2), %v480_v21, %v479_v20  ;;  %v615_v35 = vld [vmem:[%s4227_s6 + $0x28] sm:$0xff] (!%p313_p2)  ;;  %v613_v38 = vld [vmem:[%s4227_s6 + $0x18] sm:$0xff] (!%p313_p2)  ;;  %v614_v45 = vld [vmem:[%s4227_s6 + $0x20] sm:$0xff] (!%p313_p2)  ;;  %566 = vst.msk [vmem:[#allocation2] sm:$0x1] (!%p313_p2), %vm565_vm3, %v3238_v15 }
   0xc   : > { %v617_v39 = vld [vmem:[%s4227_s6 + $0x38] sm:$0xff] (!%p313_p2)  ;;  %v2904_v42 = vpack.c.bf16 (!%p313_p2), %v615_v35, %v611_v34  ;;  %v612_v46 = vld [vmem:[%s4227_s6 + $0x10] sm:$0xff] (!%p313_p2)  ;;  %v2906_v49 = vpack.c.bf16 (!%p313_p2), %v614_v45, %v610_v44  ;;  %v619_v53 = vld [vmem:[%s4227_s6 + $0x48] sm:$0xff] (!%p313_p2)  ;;  %567 = vst.msk [vmem:[#allocation2 + $0x11] sm:$0x1] (!%p313_p2), %vm565_vm3, %v3238_v15 }
   0xd   : > { %s4233_s14 = smov (!%p350_p3, %s2629_s14), 1  ;;  %2879 = vmatpush3.bf16.msra.mxu0 %v2876_v10  ;;  %v2920_v43 = vpack.c.bf16 %v617_v39, %v613_v38  ;;  %v616_v47 = vld [vmem:[%s4227_s6 + $0x30] sm:$0xff]  ;;  %v623_v54 = vld [vmem:[%s4227_s6 + $0x68] sm:$0xff]  ;;  %v621_v55 = vld [vmem:[%s4227_s6 + $0x58] sm:$0xff]  ;;  %571 = vst.msk [vmem:[#allocation3] sm:$0x3] %vm570_vm4, %v3238_v15 }
   0xe   : > { %s3216_s19 = smul.u32 24, %s4233_s14  ;;  %2895 = vmatpush3.bf16.msra.mxu1 %v2892_v11  ;;  %2881 = vmatprep.subr.bf16.mxu0 %v2880_v16  ;;  %v2922_v50 = vpack.c.bf16 %v616_v47, %v612_v46  ;;  %v2908_v56 = vpack.c.bf16 %v623_v54, %v619_v53  ;;  %v625_v57 = vld [vmem:[%s4227_s6 + $0x78] sm:$0xff]  ;;  %v618_v59 = vld [vmem:[%s4227_s6 + $0x40] sm:$0xff]  ;;  %v620_v0 = vld [vmem:[%s4227_s6 + $0x50] sm:$0xff]  ;;  %572 = vst.msk [vmem:[#allocation3 + $0x12] sm:$0x3] %vm570_vm4, %v3238_v15 }
   0xf   : > { %2897 = vmatprep.subr.bf16.mxu1 %v2896_v18  ;;  %v622_v60 = vld [vmem:[%s4227_s6 + $0x60] sm:$0xff]  ;;  %v2924_v61 = vpack.c.bf16 %v625_v57, %v621_v55  ;;  %v624_v1 = vld [vmem:[%s4227_s6 + $0x70] sm:$0xff]  ;;  %v627_v3 = vld [vmem:[%s4227_s6 + $0x88] sm:$0xff]  ;;  %s2813_s20 = sshll.u32 %s4233_s14, 6 }
  0x10   : > { %s354_s26 = scalar_lea.vmem %s4221_s0, %s3216_s19  ;;  %s3236_s19 = smov 124   ;;  %v2910_v63 = vpack.c.bf16 %v622_v60, %v618_v59  ;;  %v2926_v2 = vpack.c.bf16 %v624_v1, %v620_v0  ;;  %v631_v4 = vld [vmem:[%s4227_s6 + $0xa8] sm:$0xff]  ;;  %v629_v5 = vld [vmem:[%s4227_s6 + $0x98] sm:$0xff]  ;;  %v626_v8 = vld [vmem:[%s4227_s6 + $0x80] sm:$0xff] }
  0x11   : > { %v360_v22 = vld [vmem:[%s354_s26] sm:$0xff]  ;;  %v3356_v23 = vld [vmem:[%s354_s26 + $0x8] sm:$0xff]  ;;  %v362_v24 = vld [vmem:[%s354_s26 + $0x10] sm:$0x3]  ;;  %2883 = vmatpush3.bf16.msra.mxu0 %v2880_v16  ;;  %v2912_v6 = vpack.c.bf16 %v631_v4, %v627_v3 }
  0x12   : > { %v382_v25 = vrot.slane %v360_v22, 1  ;;  %v383_v26 = vrot.slane %v3356_v23, 1  ;;  %v2301_v27 = vrot.slane %v360_v22, 2  ;;  %v2302_v28 = vrot.slane %v3356_v23, 2  ;;  %2899 = vmatpush3.bf16.msra.mxu1 %v2896_v18  ;;  %2885 = vmatprep.subr.bf16.mxu0 %v2884_v30  ;;  %v633_v7 = vld [vmem:[%s4227_s6 + $0xb8] sm:$0xff]  ;;  %v630_v9 = vld [vmem:[%s4227_s6 + $0xa0] sm:$0xff] }
  0x13   : > { %v385_v29 = vrot.slane %v362_v24, 1  ;;  %2901 = vmatprep.subr.bf16.mxu1 %v2900_v33  ;;  %v2304_v52 = vrot.slane %v362_v24, 2  ;;  %v2928_v10 = vpack.c.bf16 %v633_v7, %v629_v5  ;;  %v2914_v11 = vpack.c.bf16 %v630_v9, %v626_v8  ;;  %v628_v12 = vld [vmem:[%s4227_s6 + $0x90] sm:$0xff]  ;;  %v635_v16 = vld [vmem:[%s4227_s6 + $0xc8] sm:$0xff]  ;;  %v637_v18 = vld [vmem:[%s4227_s6 + $0xd8] sm:$0xff] }
  0x14   : > { %v384_v31 = vsel %vm381_vm0, %v382_v25, %v383_v26  ;;  %v2303_v32 = vsel %vm2300_vm1, %v2301_v27, %v2302_v28  ;;  %v632_v13 = vld [vmem:[%s4227_s6 + $0xb0] sm:$0xff]  ;;  %v639_v17 = vld [vmem:[%s4227_s6 + $0xe8] sm:$0xff]  ;;  %v641_v20 = vld [vmem:[%s4227_s6 + $0xf8] sm:$0xff] }
  0x15   : > { %387 = vrot.lane.b32.xlu0 %v384_v31, %s3236_s19  ;;  %v2298_v36 = vmax.f32 %v360_v22, %v384_v31  ;;  %v386_v37 = vsel %vm381_vm0, %v383_v26, %v385_v29  ;;  %2887 = vmatpush3.bf16.msra.mxu0 %v2884_v30  ;;  %v2305_v58 = vsel %vm2300_vm1, %v2302_v28, %v2304_v52  ;;  %v634_v21 = vld [vmem:[%s4227_s6 + $0xc0] sm:$0xff]  ;;  %v636_v25 = vld [vmem:[%s4227_s6 + $0xd0] sm:$0xff]  ;;  %v577_v27 = vld [vmem:[%s4222_s1 + $0x8] sm:$0xff] }
  0x16   : > { %v2299_v40 = vmax.f32 %v3356_v23, %v386_v37  ;;  %2903 = vmatpush3.bf16.msra.mxu1 %v2900_v33  ;;  %2905 = vmatprep.subr.bf16.mxu0 %v2904_v42  ;;  %v2930_v14 = vpack.c.bf16 %v632_v13, %v628_v12  ;;  %v2916_v19 = vpack.c.bf16 %v639_v17, %v635_v16  ;;  %v638_v22 = vld [vmem:[%s4227_s6 + $0xe0] sm:$0xff]  ;;  %v640_v26 = vld [vmem:[%s4227_s6 + $0xf0] sm:$0xff]  ;;  %v581_v29 = vld [vmem:[%s4222_s1 + $0x28] sm:$0xff] }
  0x17   : > { %v3377_v41 = vmax.f32 %v2298_v36, %v2303_v32  ;;  %2921 = vmatprep.subr.bf16.mxu1 %v2920_v43  ;;  %v2932_v23 = vpack.c.bf16 %v641_v20, %v637_v18  ;;  %v2918_v24 = vpack.c.bf16 %v638_v22, %v634_v21  ;;  %v2934_v28 = vpack.c.bf16 %v640_v26, %v636_v25  ;;  %v579_v30 = vld [vmem:[%s4222_s1 + $0x18] sm:$0xff]  ;;  %v2637_v34 = vld [vmem:[%s4224_s3] ss:$0 sm:$0xff]  ;;  %v578_v53 = vld [vmem:[%s4222_s1 + $0x10] sm:$0xff] }
  0x18   : > { %v3427_v62 = vmax.f32 %v2299_v40, %v2305_v58  ;;  %v583_v31 = vld [vmem:[%s4222_s1 + $0x38] sm:$0xff]  ;;  %v2936_v32 = vpack.c.bf16 %v581_v29, %v577_v27  ;;  %v2640_v35 = vld [vmem:[%s4226_s5] ss:$0 sm:$0xff]  ;;  %v582_v54 = vld [vmem:[%s4222_s1 + $0x30] sm:$0xff] }
  0x19   : > { %389 = vrot.lane.b32.xlu0 %v386_v37, %s3236_s19  ;;  %2312 = vrot.lane.b32.xlu1 %v3377_v41, %s3236_s19  ;;  %v2952_v33 = vpack.c.bf16 %v583_v31, %v579_v30  ;;  %v580_v52 = vld [vmem:[%s4222_s1 + $0x20] sm:$0xff]  ;;  %v585_v55 = vld [vmem:[%s4222_s1 + $0x48] sm:$0xff]  ;;  %v2954_v60 = vpack.c.bf16 %v582_v54, %v578_v53 }
  0x1a   : > { %v587_v57 = vld [vmem:[%s4222_s1 + $0x58] sm:$0xff]  ;;  %v586_v0 = vld [vmem:[%s4222_s1 + $0x50] sm:$0xff]  ;;  %v597_v3 = vld [vmem:[%s4222_s1 + $0xa8] sm:$0xff] }
  0x1b   : > { %v591_v58 = vld [vmem:[%s4222_s1 + $0x78] sm:$0xff]  ;;  %v590_v1 = vld [vmem:[%s4222_s1 + $0x70] sm:$0xff]  ;;  %v596_v12 = vld [vmem:[%s4222_s1 + $0xa0] sm:$0xff] }
  0x1c   : > { %v595_v7 = vld [vmem:[%s4222_s1 + $0x98] sm:$0xff]  ;;  %v594_v13 = vld [vmem:[%s4222_s1 + $0x90] sm:$0xff]  ;;  %v601_v18 = vld [vmem:[%s4222_s1 + $0xc8] sm:$0xff] }
  0x1d   : > { %2320 = vrot.lane.b32.xlu1 %v3377_v41, %s3237_s24  ;;  %2314 = vrot.lane.b32.xlu0 %v3427_v62, %s3236_s19  ;;  %v599_v8 = vld [vmem:[%s4222_s1 + $0xb8] sm:$0xff]  ;;  %v598_v17 = vld [vmem:[%s4222_s1 + $0xb0] sm:$0xff]  ;;  %s359_s19 = scalar_lea.vmem %s4231_s10, %s2813_s20 }
  0x1e   : > { %v2960_v16 = vpack.c.bf16 %v599_v8, %v595_v7  ;;  %v603_v21 = vld [vmem:[%s4222_s1 + $0xd8] sm:$0xff]  ;;  %v600_v25 = vld [vmem:[%s4222_s1 + $0xc0] sm:$0xff]  ;;  %v602_v29 = vld [vmem:[%s4222_s1 + $0xd0] sm:$0xff] }
  0x1f   : > { %v607_v22 = vld [vmem:[%s4222_s1 + $0xf8] sm:$0xff]  ;;  %v604_v26 = vld [vmem:[%s4222_s1 + $0xe0] sm:$0xff]  ;;  %v606_v30 = vld [vmem:[%s4222_s1 + $0xf0] sm:$0xff] }
  0x20   : > { %v2652_v31 = vld [vmem:[%s4227_s6 + $0x108] sm:$0xff]  ;;  %v2663_v53 = vld [vmem:[%s4227_s6 + $0x160] sm:$0xff]  ;;  %v2661_v54 = vld [vmem:[%s4227_s6 + $0x150] sm:$0xff] }
  0x21   : > { %2322 = vrot.lane.b32.xlu1 %v3427_v62, %s3237_s24  ;;  %v2680_v7 = vld [vmem:[%s4227_s6 + $0x1e8] sm:$0xff]  ;;  %v2678_v8 = vld [vmem:[%s4227_s6 + $0x1d8] sm:$0xff] }
  0x87   : > { %v3396_v48 = vpop.permute.xlu0 %387 }
  0x88   : > { %2850 = vmatprep.mubr.msk.f32.mxu0 %vm391_vm2, %v3396_v48  ;;  %2869 = vmatprep.mubr.msk.f32.mxu1 %vm391_vm2, %v3396_v48 }
  0x8b   : > { %v3402_v51 = vpop.permute.xlu0 %389 }
  0x8c   : > { %2851 = vmatmul.mubr.msk.f32.vlgmr.msra.gmra.mrb[0].mxu0 %vm391_vm2, %v3402_v51  ;;  %2870 = vmatmul.mubr.msk.f32.vlgmr.msra.gmra.mrb[0].mxu1 %vm391_vm2, %v3402_v51 }
  0x8d   : > { %2907 = vmatpush1.bf16.msra.mxu0 %v2906_v49  ;;  %2923 = vmatpush1.bf16.msra.mxu1 %v2922_v50  ;;  %v576_v50 = vld [vmem:[%s4222_s1] sm:$0xff] }
  0x8e   : > { %2909 = vmatprep.subr.bf16.mxu0 %v2908_v56  ;;  %2925 = vmatprep.subr.bf16.mxu1 %v2924_v61  ;;  %v589_v56 = vld [vmem:[%s4222_s1 + $0x68] sm:$0xff]  ;;  %v2938_v59 = vpack.c.bf16 %v580_v52, %v576_v50  ;;  %v584_v61 = vld [vmem:[%s4222_s1 + $0x40] sm:$0xff] }
  0x8f   : > { %712 = vmatprep.mubr.f32.mxu0 %v3238_v15  ;;  %789 = vmatprep.mubr.f32.mxu1 %v3238_v15  ;;  %v2940_v5 = vpack.c.bf16 %v589_v56, %v585_v55  ;;  %v2659_v52 = vld [vmem:[%s4227_s6 + $0x140] sm:$0xff]  ;;  %v2665_v55 = vld [vmem:[%s4227_s6 + $0x170] sm:$0xff]  ;;  %v2668_v56 = vld [vmem:[%s4227_s6 + $0x188] sm:$0xff] }
  0x91   : > { %2911 = vmatpush1.bf16.msra.mxu0 %v2910_v63  ;;  %2927 = vmatpush1.bf16.msra.mxu1 %v2926_v2  ;;  %v588_v63 = vld [vmem:[%s4222_s1 + $0x60] sm:$0xff]  ;;  %v593_v2 = vld [vmem:[%s4222_s1 + $0x88] sm:$0xff] }
  0x92   : > { %2913 = vmatprep.subr.bf16.mxu0 %v2912_v6  ;;  %2929 = vmatprep.subr.bf16.mxu1 %v2928_v10  ;;  %v2956_v6 = vpack.c.bf16 %v591_v58, %v587_v57  ;;  %v2942_v9 = vpack.c.bf16 %v588_v63, %v584_v61  ;;  %v2958_v10 = vpack.c.bf16 %v590_v1, %v586_v0  ;;  %v2674_v61 = vld [vmem:[%s4227_s6 + $0x1b8] sm:$0xff]  ;;  %v2667_v1 = vld [vmem:[%s4227_s6 + $0x180] sm:$0xff] }
  0x93   : > { %v2974_v63 = vpack.c.bf16 %v2663_v53, %v2659_v52  ;;  %v2990_v0 = vpack.c.bf16 %v2665_v55, %v2661_v54  ;;  %v2703_v52 = vld [vmem:[%s4227_s6 + $0x280] sm:$0xff]  ;;  %v2705_v54 = vld [vmem:[%s4227_s6 + $0x290] sm:$0xff] }
  0x94   : > { %v2707_v53 = vld [vmem:[%s4227_s6 + $0x2a0] sm:$0xff] }
  0x95   : > { %2915 = vmatpush1.bf16.msra.mxu0 %v2914_v11  ;;  %2931 = vmatpush1.bf16.msra.mxu1 %v2930_v14  ;;  %v592_v11 = vld [vmem:[%s4222_s1 + $0x80] sm:$0xff]  ;;  %v2944_v14 = vpack.c.bf16 %v597_v3, %v593_v2 }
  0x96   : > { %2917 = vmatprep.subr.bf16.mxu0 %v2916_v19  ;;  %2933 = vmatprep.subr.bf16.mxu1 %v2932_v23  ;;  %v605_v19 = vld [vmem:[%s4222_s1 + $0xe8] sm:$0xff]  ;;  %v2946_v23 = vpack.c.bf16 %v596_v12, %v592_v11  ;;  %v2671_v2 = vld [vmem:[%s4227_s6 + $0x1a0] sm:$0xff] }
  0x97   : > { %v2948_v27 = vpack.c.bf16 %v605_v19, %v601_v18  ;;  %v2675_v12 = vld [vmem:[%s4227_s6 + $0x1c0] sm:$0xff]  ;;  %v2688_v18 = vld [vmem:[%s4227_s6 + $0x208] sm:$0xff] }
  0x98   : > { %v2692_v19 = vld [vmem:[%s4227_s6 + $0x228] sm:$0xff] }
  0x99   : > { %2919 = vmatpush1.bf16.msra.mxu0 %v2918_v24  ;;  %2935 = vmatpush1.bf16.msra.mxu1 %v2934_v28  ;;  %v2962_v24 = vpack.c.bf16 %v598_v17, %v594_v13  ;;  %v2964_v28 = vpack.c.bf16 %v607_v22, %v603_v21  ;;  %v2679_v13 = vld [vmem:[%s4227_s6 + $0x1e0] sm:$0xff]  ;;  %v2681_v17 = vld [vmem:[%s4227_s6 + $0x1f0] sm:$0xff]  ;;  %v2694_v21 = vld [vmem:[%s4227_s6 + $0x238] sm:$0xff] }
  0x9a   : > { %2937 = vmatprep.subr.bf16.mxu0 %v2936_v32  ;;  %2953 = vmatprep.subr.bf16.mxu1 %v2952_v33  ;;  %v2656_v32 = vld [vmem:[%s4227_s6 + $0x128] sm:$0xff]  ;;  %v2654_v33 = vld [vmem:[%s4227_s6 + $0x118] sm:$0xff]  ;;  %v2982_v22 = vpack.c.bf16 %v2679_v13, %v2675_v12  ;;  %v1364_v13 = vld [vmem:[%s4228_s7] sm:$0xff] }
 0x15f   : > { %v2852_v36 = vpop.f32.mrb[0].mxu0  ;;  %v2871_v37 = vpop.f32.mrb[0].mxu1 }
 0x160   : > { %v468_v38 = vadd.f32 %v2852_v36, %v2637_v34  ;;  %v560_v39 = vadd.f32 %v2871_v37, %v2640_v35  ;;  %v462_v40 = vpop.f32.mrb[1].mxu0  ;;  %v554_v42 = vpop.f32.mrb[1].mxu1  ;;  %v2966_v36 = vpack.c.bf16 %v606_v30, %v602_v29  ;;  %v2651_v37 = vld [vmem:[%s4227_s6 + $0x100] sm:$0xff]  ;;  %v2693_v29 = vld [vmem:[%s4227_s6 + $0x230] sm:$0xff]  ;;  %v2696_v30 = vld [vmem:[%s4227_s6 + $0x248] sm:$0xff] }
 0x161   : > { %v463_v43 = vadd.f32 %v2637_v34, %v462_v40  ;;  %v555_v44 = vadd.f32 %v2640_v35, %v554_v42  ;;  %v2658_v34 = vld [vmem:[%s4227_s6 + $0x138] sm:$0xff]  ;;  %v2950_v35 = vpack.c.bf16 %v604_v26, %v600_v25  ;;  %v2655_v40 = vld [vmem:[%s4227_s6 + $0x120] sm:$0xff]  ;;  %v2653_v42 = vld [vmem:[%s4227_s6 + $0x110] sm:$0xff]  ;;  %v3000_v25 = vpack.c.bf16 %v2692_v19, %v2688_v18 }
 0x162   : > { %v472_v45 = vmax.f32 %v468_v38, 0.0  ;;  %v564_v46 = vmax.f32 %v560_v39, 0.0  ;;  %v2968_v38 = vpack.c.bf16 %v2656_v32, %v2652_v31  ;;  %v2984_v39 = vpack.c.bf16 %v2658_v34, %v2654_v33  ;;  %v2700_v31 = vld [vmem:[%s4227_s6 + $0x268] sm:$0xff]  ;;  %v2698_v32 = vld [vmem:[%s4227_s6 + $0x258] sm:$0xff]  ;;  %v1370_v18 = vld [vmem:[%s4228_s7 + $0x30] sm:$0xff] }
 0x163   : > { %v471_v47 = vmax.f32 %v463_v43, 0.0  ;;  %v563_v49 = vmax.f32 %v555_v44, 0.0  ;;  %v2657_v43 = vld [vmem:[%s4227_s6 + $0x130] sm:$0xff]  ;;  %v2660_v44 = vld [vmem:[%s4227_s6 + $0x148] sm:$0xff]  ;;  %v2702_v33 = vld [vmem:[%s4227_s6 + $0x278] sm:$0xff] }
 0x164   : > { %569 = vst.msk [vmem:[#allocation2 + $0x9] sm:$0xff] %vm391_vm2, %v472_v45  ;;  %v2664_v45 = vld [vmem:[%s4227_s6 + $0x168] sm:$0xff]  ;;  %v2986_v50 = vpack.c.bf16 %v2657_v43, %v2653_v42 }
 0x165   : > { %575 = vst.msk [vmem:[#allocation3 + $0xa] sm:$0xff] %vm573_vm5, %v564_v46  ;;  %574 = vst.msk [vmem:[#allocation3 + $0x2] sm:$0xff] %vm573_vm5, %v563_v49  ;;  %v2662_v46 = vld [vmem:[%s4227_s6 + $0x158] sm:$0xff]  ;;  %v2970_v49 = vpack.c.bf16 %v2655_v40, %v2651_v37  ;;  %v2972_v57 = vpack.c.bf16 %v2664_v45, %v2660_v44  ;;  %v2699_v37 = vld [vmem:[%s4227_s6 + $0x260] sm:$0xff]  ;;  %v3004_v44 = vpack.c.bf16 %v2700_v31, %v2696_v30 }
 0x166   : > { %568 = vst.msk [vmem:[#allocation2 + $0x1] sm:$0xff] %vm391_vm2, %v471_v47  ;;  %v2666_v47 = vld [vmem:[%s4227_s6 + $0x178] sm:$0xff]  ;;  %v2704_v40 = vld [vmem:[%s4227_s6 + $0x288] sm:$0xff]  ;;  %v3020_v45 = vpack.c.bf16 %v2702_v33, %v2698_v32 }
 0x167   : > { %v2988_v58 = vpack.c.bf16 %v2666_v47, %v2662_v46  ;;  %v2708_v42 = vld [vmem:[%s4227_s6 + $0x2a8] sm:$0xff]  ;;  %v2706_v46 = vld [vmem:[%s4227_s6 + $0x298] sm:$0xff] }
 0x168   : > { %v2710_v47 = vld [vmem:[%s4227_s6 + $0x2b8] sm:$0xff]  ;;  %v3008_v55 = vpack.c.bf16 %v2708_v42, %v2704_v40  ;;  %v1373_v19 = vld [vmem:[%s4228_s7 + $0x48] sm:$0xff]  ;;  %v2729_v40 = vld [vmem:[%s4228_s7 + $0x90] sm:$0xff] }
 0x169   : > { %v2728_v32 = vld [vmem:[%s4228_s7 + $0x88] sm:$0xff]  ;;  %v2733_v42 = vld [vmem:[%s4228_s7 + $0xb0] sm:$0xff] }
 0x16a   : > { %v2732_v33 = vld [vmem:[%s4228_s7 + $0xa8] sm:$0xff] }
 0x16d   : > { %v608_v4 = vld [vmem:[#allocation2] sm:$0xff]  ;;  %v609_v20 = vld [vmem:[#allocation2 + $0x8] sm:$0xff] }
 0x16e   : > { %2643 = vmatmul.mubr.msk.f32.vlgmr.msra.gmra.mrb[2].mxu0 %vm391_vm2, %v608_v4  ;;  %2645 = vmatmul.mubr.msk.f32.vlgmr.msra.gmra.mrb[2].mxu1 %vm391_vm2, %v608_v4  ;;  %v956_v43 = vld [vmem:[#allocation2 + $0x1] sm:$0xff] }
 0x16f   : > { %2939 = vmatpush1.bf16.msra.mxu0 %v2938_v59  ;;  %2955 = vmatpush1.bf16.msra.mxu1 %v2954_v60  ;;  %v2672_v59 = vld [vmem:[%s4227_s6 + $0x1a8] sm:$0xff]  ;;  %v2670_v60 = vld [vmem:[%s4227_s6 + $0x198] sm:$0xff] }
 0x170   : > { %718 = vmatprep.mubr.f32.mxu0 %v3238_v15  ;;  %795 = vmatprep.mubr.f32.mxu1 %v3238_v15  ;;  %v2976_v3 = vpack.c.bf16 %v2672_v59, %v2668_v56  ;;  %v2992_v4 = vpack.c.bf16 %v2674_v61, %v2670_v60  ;;  %v3024_v56 = vpack.c.bf16 %v2710_v47, %v2706_v46  ;;  %v2716_v59 = vld [vmem:[%s4227_s6 + $0x2e8] sm:$0xff]  ;;  %v2714_v61 = vld [vmem:[%s4227_s6 + $0x2d8] sm:$0xff] }
 0x171   : > { %2941 = vmatprep.subr.bf16.mxu0 %v2940_v5  ;;  %2957 = vmatprep.subr.bf16.mxu1 %v2956_v6  ;;  %v2673_v5 = vld [vmem:[%s4227_s6 + $0x1b0] sm:$0xff]  ;;  %v2676_v6 = vld [vmem:[%s4227_s6 + $0x1c8] sm:$0xff] }
 0x172   : > { %2644 = vmatmul.mubr.msk.f32.gmra.mrb[4].mxu0 %vm391_vm2, %v609_v20  ;;  %2646 = vmatmul.mubr.msk.f32.gmra.mrb[4].mxu1 %vm391_vm2, %v609_v20  ;;  %v2690_v20 = vld [vmem:[%s4227_s6 + $0x218] sm:$0xff]  ;;  %v957_v60 = vld [vmem:[#allocation2 + $0x9] sm:$0xff] }
 0x173   : > { %2943 = vmatpush1.bf16.msra.mxu0 %v2942_v9  ;;  %2959 = vmatpush1.bf16.msra.mxu1 %v2958_v10  ;;  %v2682_v9 = vld [vmem:[%s4227_s6 + $0x1f8] sm:$0xff]  ;;  %v2978_v10 = vpack.c.bf16 %v2671_v2, %v2667_v1  ;;  %v3016_v26 = vpack.c.bf16 %v2694_v21, %v2690_v20  ;;  %v2711_v2 = vld [vmem:[%s4227_s6 + $0x2c0] sm:$0xff]  ;;  %v1377_v20 = vld [vmem:[%s4228_s7 + $0x68] sm:$0xff] }
 0x174   : > { %2945 = vmatprep.subr.bf16.mxu0 %v2944_v14  ;;  %2961 = vmatprep.subr.bf16.mxu1 %v2960_v16  ;;  %v2980_v14 = vpack.c.bf16 %v2680_v7, %v2676_v6  ;;  %v2996_v16 = vpack.c.bf16 %v2682_v9, %v2678_v8  ;;  %v2717_v6 = vld [vmem:[%s4227_s6 + $0x2f0] sm:$0xff]  ;;  %v1365_v7 = vld [vmem:[%s4228_s7 + $0x8] sm:$0xff]  ;;  %v1367_v9 = vld [vmem:[%s4228_s7 + $0x18] sm:$0xff]  ;;  %v3036_v30 = vpack.c.bf16 %v1377_v20, %v1373_v19 }
 0x175   : > { %866 = vmatprep.mubr.f32.mxu0 %v3238_v15  ;;  %943 = vmatprep.mubr.f32.mxu1 %v3238_v15  ;;  %v1369_v8 = vld [vmem:[%s4228_s7 + $0x28] sm:$0xff]  ;;  %v1375_v21 = vld [vmem:[%s4228_s7 + $0x58] sm:$0xff]  ;;  %v2761_v19 = vld [vmem:[%s4228_s7 + $0x170] sm:$0xff] }
 0x176   : > { %v2736_v46 = vld [vmem:[%s4228_s7 + $0xc8] sm:$0xff]  ;;  %v1548_v20 = vld [vmem:[#allocation3 + $0x1] sm:$0xff] }
 0x177   : > { %2947 = vmatpush1.bf16.msra.mxu0 %v2946_v23  ;;  %2963 = vmatpush1.bf16.msra.mxu1 %v2962_v24  ;;  %v2687_v24 = vld [vmem:[%s4227_s6 + $0x200] sm:$0xff]  ;;  %v2740_v47 = vld [vmem:[%s4228_s7 + $0xe8] sm:$0xff] }
 0x178   : > { %2949 = vmatprep.subr.bf16.mxu0 %v2948_v27  ;;  %2965 = vmatprep.subr.bf16.mxu1 %v2964_v28  ;;  %v2691_v27 = vld [vmem:[%s4227_s6 + $0x220] sm:$0xff]  ;;  %v2689_v28 = vld [vmem:[%s4227_s6 + $0x210] sm:$0xff] }
 0x179   : > { %v3002_v34 = vpack.c.bf16 %v2691_v27, %v2687_v24  ;;  %v1374_v27 = vld [vmem:[%s4228_s7 + $0x50] sm:$0xff] }
 0x17b   : > { %2951 = vmatpush1.bf16.msra.mxu0 %v2950_v35  ;;  %2967 = vmatpush1.bf16.msra.mxu1 %v2966_v36  ;;  %v3018_v35 = vpack.c.bf16 %v2693_v29, %v2689_v28  ;;  %v2695_v36 = vld [vmem:[%s4227_s6 + $0x240] sm:$0xff]  ;;  %v1378_v28 = vld [vmem:[%s4228_s7 + $0x70] sm:$0xff] }
 0x17c   : > { %2969 = vmatprep.subr.bf16.mxu0 %v2968_v38  ;;  %2985 = vmatprep.subr.bf16.mxu1 %v2984_v39  ;;  %v2697_v38 = vld [vmem:[%s4227_s6 + $0x250] sm:$0xff]  ;;  %v1159_v29 = vld [vmem:[#allocation2 + $0x2] sm:$0xff] }
 0x17d   : > { %v2701_v39 = vld [vmem:[%s4227_s6 + $0x270] sm:$0xff] }
 0x17e   : > { %2647 = vmatmul.mubr.msk.f32.vlgmr.msra.gmra.mrb[2].mxu0 %vm391_vm2, %v3396_v48  ;;  %2649 = vmatmul.mubr.msk.f32.vlgmr.msra.gmra.mrb[2].mxu1 %vm391_vm2, %v3396_v48  ;;  %v2669_v48 = vld [vmem:[%s4227_s6 + $0x190] sm:$0xff] }
 0x17f   : > { %2971 = vmatpush1.bf16.msra.mxu0 %v2970_v49  ;;  %2987 = vmatpush1.bf16.msra.mxu1 %v2986_v50  ;;  %v2994_v11 = vpack.c.bf16 %v2673_v5, %v2669_v48  ;;  %v3006_v49 = vpack.c.bf16 %v2699_v37, %v2695_v36  ;;  %v3022_v50 = vpack.c.bf16 %v2701_v39, %v2697_v38  ;;  %v2713_v5 = vld [vmem:[%s4227_s6 + $0x2d0] sm:$0xff]  ;;  %v2727_v38 = vld [vmem:[%s4228_s7 + $0x80] sm:$0xff] }
 0x180   : > { %872 = vmatprep.mubr.f32.mxu0 %v3238_v15  ;;  %949 = vmatprep.mubr.f32.mxu1 %v3238_v15  ;;  %v3030_v12 = vpack.c.bf16 %v2717_v6, %v2713_v5  ;;  %v3046_v37 = vpack.c.bf16 %v1378_v28, %v1374_v27  ;;  %v2731_v39 = vld [vmem:[%s4228_s7 + $0xa0] sm:$0xff]  ;;  %v2749_v5 = vld [vmem:[%s4228_s7 + $0x110] sm:$0xff] }
 0x181   : > { %2973 = vmatprep.subr.bf16.mxu0 %v2972_v57  ;;  %2989 = vmatprep.subr.bf16.mxu1 %v2988_v58  ;;  %v2709_v57 = vld [vmem:[%s4227_s6 + $0x2b0] sm:$0xff]  ;;  %v2712_v58 = vld [vmem:[%s4227_s6 + $0x2c8] sm:$0xff] }
 0x182   : > { %2648 = vmatmul.mubr.msk.f32.gmra.mrb[4].mxu0 %vm391_vm2, %v3402_v51  ;;  %2650 = vmatmul.mubr.msk.f32.gmra.mrb[4].mxu1 %vm391_vm2, %v3402_v51  ;;  %v2677_v51 = vld [vmem:[%s4227_s6 + $0x1d0] sm:$0xff]  ;;  %v3026_v1 = vpack.c.bf16 %v2709_v57, %v2705_v54  ;;  %v2735_v54 = vld [vmem:[%s4228_s7 + $0xc0] sm:$0xff] }
 0x183   : > { %2975 = vmatpush1.bf16.msra.mxu0 %v2974_v63  ;;  %2991 = vmatpush1.bf16.msra.mxu1 %v2990_v0  ;;  %v2998_v23 = vpack.c.bf16 %v2681_v17, %v2677_v51  ;;  %v2718_v63 = vld [vmem:[%s4227_s6 + $0x2f8] sm:$0xff]  ;;  %v3010_v0 = vpack.c.bf16 %v2707_v53, %v2703_v52  ;;  %v1368_v51 = vld [vmem:[%s4228_s7 + $0x20] sm:$0xff]  ;;  %v1366_v17 = vld [vmem:[%s4228_s7 + $0x10] sm:$0xff]  ;;  %v3050_v52 = vpack.c.bf16 %v2731_v39, %v2727_v38 }
 0x184   : > { %2977 = vmatprep.subr.bf16.mxu0 %v2976_v3  ;;  %2993 = vmatprep.subr.bf16.mxu1 %v2992_v4  ;;  %v2715_v3 = vld [vmem:[%s4227_s6 + $0x2e0] sm:$0xff]  ;;  %v3012_v4 = vpack.c.bf16 %v2716_v59, %v2712_v58  ;;  %v3028_v48 = vpack.c.bf16 %v2718_v63, %v2714_v61  ;;  %v3042_v24 = vpack.c.bf16 %v1370_v18, %v1366_v17  ;;  %v2741_v57 = vld [vmem:[%s4228_s7 + $0xf0] sm:$0xff]  ;;  %v1362_v58 = vld [vmem:[#allocation3] sm:$0xff] }
 0x185   : > { %1061 = vmatprep.mubr.f32.mxu0 %v3238_v15  ;;  %1138 = vmatprep.mubr.f32.mxu1 %v3238_v15  ;;  %v3058_v53 = vpack.c.bf16 %v2733_v42, %v2729_v40  ;;  %v3052_v59 = vpack.c.bf16 %v2740_v47, %v2736_v46  ;;  %v2748_v61 = vld [vmem:[%s4228_s7 + $0x108] sm:$0xff]  ;;  %v2753_v6 = vld [vmem:[%s4228_s7 + $0x130] sm:$0xff]  ;;  %v2759_v17 = vld [vmem:[%s4228_s7 + $0x160] sm:$0xff] }
 0x186   : > { %v2752_v63 = vld [vmem:[%s4228_s7 + $0x128] sm:$0xff]  ;;  %v2757_v18 = vld [vmem:[%s4228_s7 + $0x150] sm:$0xff]  ;;  %v2778_v38 = vld [vmem:[%s4228_s7 + $0x1d8] sm:$0xff] }
 0x187   : > { %2979 = vmatpush1.bf16.msra.mxu0 %v2978_v10  ;;  %2995 = vmatpush1.bf16.msra.mxu1 %v2994_v11  ;;  %v1371_v10 = vld [vmem:[%s4228_s7 + $0x38] sm:$0xff]  ;;  %v3014_v11 = vpack.c.bf16 %v2715_v3, %v2711_v2  ;;  %v3078_v28 = vpack.c.bf16 %v2761_v19, %v2757_v18  ;;  %v2781_v46 = vld [vmem:[%s4228_s7 + $0x1f0] sm:$0xff] }
 0x188   : > { %2981 = vmatprep.subr.bf16.mxu0 %v2980_v14  ;;  %2997 = vmatprep.subr.bf16.mxu1 %v2996_v16  ;;  %v3032_v14 = vpack.c.bf16 %v1369_v8, %v1365_v7  ;;  %v3040_v16 = vpack.c.bf16 %v1371_v10, %v1367_v9  ;;  %v1363_v7 = vld [vmem:[#allocation3 + $0x8] sm:$0xff]  ;;  %v3064_v8 = vpack.c.bf16 %v2752_v63, %v2748_v61  ;;  %v2756_v10 = vld [vmem:[%s4228_s7 + $0x148] sm:$0xff]  ;;  %v2782_v39 = vld [vmem:[%s4228_s7 + $0x1f8] sm:$0xff] }
 0x189   : > { %v1735_v47 = vld [vmem:[#allocation3 + $0x2] sm:$0xff]  ;;  %v2793_v61 = vld [vmem:[%s4228_s7 + $0x230] sm:$0xff]  ;;  %v1736_v63 = vld [vmem:[#allocation3 + $0xa] sm:$0xff] }
 0x18b   : > { %2983 = vmatpush1.bf16.msra.mxu0 %v2982_v22  ;;  %2999 = vmatpush1.bf16.msra.mxu1 %v2998_v23  ;;  %v1379_v22 = vld [vmem:[%s4228_s7 + $0x78] sm:$0xff]  ;;  %v3034_v23 = vpack.c.bf16 %v1368_v51, %v1364_v13  ;;  %v2755_v51 = vld [vmem:[%s4228_s7 + $0x140] sm:$0xff] }
 0x18c   : > { %3001 = vmatprep.subr.bf16.mxu0 %v3000_v25  ;;  %3017 = vmatprep.subr.bf16.mxu1 %v3016_v26  ;;  %v1372_v25 = vld [vmem:[%s4228_s7 + $0x40] sm:$0xff]  ;;  %v3044_v31 = vpack.c.bf16 %v1379_v22, %v1375_v21  ;;  %v2762_v13 = vld [vmem:[%s4228_s7 + $0x178] sm:$0xff]  ;;  %v3070_v27 = vpack.c.bf16 %v2759_v17, %v2755_v51 }
 0x18d   : > { %v1376_v26 = vld [vmem:[%s4228_s7 + $0x60] sm:$0xff]  ;;  %v2331_v51 = vld [vmem:[%s4229_s8 + $0x18] sm:$0xff] }
 0x18e   : > { %2683 = vmatmul.mubr.msk.f32.vlgmr.msra.gmra.mrb[2].mxu0 %vm391_vm2, %v956_v43  ;;  %2685 = vmatmul.mubr.msk.f32.vlgmr.msra.gmra.mrb[2].mxu1 %vm391_vm2, %v956_v43  ;;  %v3038_v36 = vpack.c.bf16 %v1376_v26, %v1372_v25  ;;  %v1160_v43 = vld [vmem:[#allocation2 + $0xa] sm:$0xff]  ;;  %v2770_v25 = vld [vmem:[%s4228_s7 + $0x198] sm:$0xff] }
 0x18f   : > { %3003 = vmatpush1.bf16.msra.mxu0 %v3002_v34  ;;  %3019 = vmatpush1.bf16.msra.mxu1 %v3018_v35  ;;  %v2730_v34 = vld [vmem:[%s4228_s7 + $0x98] sm:$0xff] }
 0x190   : > { %1067 = vmatprep.mubr.f32.mxu0 %v3238_v15  ;;  %1144 = vmatprep.mubr.f32.mxu1 %v3238_v15  ;;  %v2734_v35 = vld [vmem:[%s4228_s7 + $0xb8] sm:$0xff] }
 0x191   : > { %3005 = vmatprep.subr.bf16.mxu0 %v3004_v44  ;;  %3021 = vmatprep.subr.bf16.mxu1 %v3020_v45  ;;  %v3048_v44 = vpack.c.bf16 %v2732_v33, %v2728_v32  ;;  %v3056_v45 = vpack.c.bf16 %v2734_v35, %v2730_v34  ;;  %v2774_v26 = vld [vmem:[%s4228_s7 + $0x1b8] sm:$0xff]  ;;  %v2773_v32 = vld [vmem:[%s4228_s7 + $0x1b0] sm:$0xff]  ;;  %v1549_v33 = vld [vmem:[#allocation3 + $0x9] sm:$0xff] }
 0x192   : > { %2684 = vmatmul.mubr.msk.f32.gmra.mrb[4].mxu0 %vm391_vm2, %v957_v60  ;;  %2686 = vmatmul.mubr.msk.f32.gmra.mrb[4].mxu1 %vm391_vm2, %v957_v60  ;;  %v3088_v35 = vpack.c.bf16 %v2774_v26, %v2770_v25  ;;  %v2335_v17 = vld [vmem:[%s4229_s8 + $0x38] sm:$0xff] }
 0x193   : > { %3007 = vmatpush1.bf16.msra.mxu0 %v3006_v49  ;;  %3023 = vmatpush1.bf16.msra.mxu1 %v3022_v50  ;;  %v2738_v49 = vld [vmem:[%s4228_s7 + $0xd8] sm:$0xff]  ;;  %v3128_v26 = vpack.c.bf16 %v2335_v17, %v2331_v51  ;;  %v2528_v51 = vld [vmem:[%s4230_s9] sm:$0xf] }
 0x194   : > { %3009 = vmatprep.subr.bf16.mxu0 %v3008_v55  ;;  %3025 = vmatprep.subr.bf16.mxu1 %v3024_v56  ;;  %v2742_v50 = vld [vmem:[%s4228_s7 + $0xf8] sm:$0xff]  ;;  %v2739_v55 = vld [vmem:[%s4228_s7 + $0xe0] sm:$0xff]  ;;  %v2737_v56 = vld [vmem:[%s4228_s7 + $0xd0] sm:$0xff] }
 0x195   : > { %1264 = vmatprep.mubr.f32.mxu0 %v3238_v15  ;;  %1341 = vmatprep.mubr.f32.mxu1 %v3238_v15  ;;  %v3060_v60 = vpack.c.bf16 %v2742_v50, %v2738_v49  ;;  %v3054_v2 = vpack.c.bf16 %v2739_v55, %v2735_v54  ;;  %v3062_v3 = vpack.c.bf16 %v2741_v57, %v2737_v56  ;;  %v2790_v54 = vld [vmem:[%s4228_s7 + $0x218] sm:$0xff] }
 0x196   : > { %v3092_v50 = vpack.c.bf16 %v2782_v39, %v2778_v38  ;;  %v2794_v55 = vld [vmem:[%s4228_s7 + $0x238] sm:$0xff]  ;;  %v2349_v38 = vld [vmem:[%s4229_s8 + $0xa8] sm:$0xff] }
 0x197   : > { %3011 = vmatpush1.bf16.msra.mxu0 %v3010_v0  ;;  %3027 = vmatpush1.bf16.msra.mxu1 %v3026_v1  ;;  %v2750_v0 = vld [vmem:[%s4228_s7 + $0x118] sm:$0xff] }
 0x198   : > { %3013 = vmatprep.subr.bf16.mxu0 %v3012_v4  ;;  %3029 = vmatprep.subr.bf16.mxu1 %v3028_v48  ;;  %v2754_v1 = vld [vmem:[%s4228_s7 + $0x138] sm:$0xff]  ;;  %v2747_v4 = vld [vmem:[%s4228_s7 + $0x100] sm:$0xff] }
 0x199   : > { %v2751_v48 = vld [vmem:[%s4228_s7 + $0x120] sm:$0xff]  ;;  %v3072_v9 = vpack.c.bf16 %v2754_v1, %v2750_v0  ;;  %v3104_v1 = vpack.c.bf16 %v2794_v55, %v2790_v54  ;;  %v2350_v54 = vld [vmem:[%s4229_s8 + $0xb0] sm:$0xff]  ;;  %v2353_v55 = vld [vmem:[%s4229_s8 + $0xc8] sm:$0xff] }
 0x19a   : > { %v2109_v39 = vld [vmem:[#allocation3 + $0x4] sm:$0xff] }
 0x19b   : > { %3015 = vmatpush1.bf16.msra.mxu0 %v3014_v11  ;;  %3031 = vmatpush1.bf16.msra.mxu1 %v3030_v12  ;;  %v2760_v11 = vld [vmem:[%s4228_s7 + $0x168] sm:$0xff]  ;;  %v2758_v12 = vld [vmem:[%s4228_s7 + $0x158] sm:$0xff] }
 0x19c   : > { %3033 = vmatprep.subr.bf16.mxu0 %v3032_v14  ;;  %3041 = vmatprep.subr.bf16.mxu1 %v3040_v16  ;;  %v3066_v14 = vpack.c.bf16 %v2751_v48, %v2747_v4  ;;  %v3074_v16 = vpack.c.bf16 %v2753_v6, %v2749_v5  ;;  %v3068_v21 = vpack.c.bf16 %v2760_v11, %v2756_v10  ;;  %v2798_v4 = vld [vmem:[%s4228_s7 + $0x258] sm:$0xff]  ;;  %v2801_v10 = vld [vmem:[%s4228_s7 + $0x270] sm:$0xff] }
 0x19d   : > { %v3076_v22 = vpack.c.bf16 %v2762_v13, %v2758_v12  ;;  %v2802_v48 = vld [vmem:[%s4228_s7 + $0x278] sm:$0xff] }
 0x19e   : > { %2719 = vmatmul.mubr.msk.f32.vlgmr.msra.gmra.mrb[2].mxu0 %vm391_vm2, %v1159_v29  ;;  %2721 = vmatmul.mubr.msk.f32.vlgmr.msra.gmra.mrb[2].mxu1 %vm391_vm2, %v1159_v29  ;;  %v2767_v29 = vld [vmem:[%s4228_s7 + $0x180] sm:$0xff]  ;;  %v3108_v13 = vpack.c.bf16 %v2802_v48, %v2798_v4  ;;  %v2354_v4 = vld [vmem:[%s4229_s8 + $0xd0] sm:$0xff] }
 0x19f   : > { %3035 = vmatpush1.bf16.msra.mxu0 %v3034_v23  ;;  %3043 = vmatpush1.bf16.msra.mxu1 %v3042_v24  ;;  %v2768_v23 = vld [vmem:[%s4228_s7 + $0x188] sm:$0xff]  ;;  %v1922_v11 = vld [vmem:[#allocation3 + $0x3] sm:$0xff]  ;;  %v2358_v48 = vld [vmem:[%s4229_s8 + $0xf0] sm:$0xff] }
 0x1a0   : > { %1270 = vmatprep.mubr.f32.mxu0 %v3238_v15  ;;  %1347 = vmatprep.mubr.f32.mxu1 %v3238_v15  ;;  %v2772_v24 = vld [vmem:[%s4228_s7 + $0x1a8] sm:$0xff] }
 0x1a1   : > { %3037 = vmatprep.subr.bf16.mxu0 %v3036_v30  ;;  %3045 = vmatprep.subr.bf16.mxu1 %v3044_v31  ;;  %v2771_v30 = vld [vmem:[%s4228_s7 + $0x1a0] sm:$0xff]  ;;  %v2769_v31 = vld [vmem:[%s4228_s7 + $0x190] sm:$0xff]  ;;  %v3080_v34 = vpack.c.bf16 %v2772_v24, %v2768_v23 }
 0x1a2   : > { %2720 = vmatmul.mubr.msk.f32.gmra.mrb[4].mxu0 %vm391_vm2, %v1160_v43  ;;  %2722 = vmatmul.mubr.msk.f32.gmra.mrb[4].mxu1 %vm391_vm2, %v1160_v43  ;;  %v3082_v40 = vpack.c.bf16 %v2771_v30, %v2767_v29  ;;  %v3090_v42 = vpack.c.bf16 %v2773_v32, %v2769_v31  ;;  %v2775_v43 = vld [vmem:[%s4228_s7 + $0x1c0] sm:$0xff]  ;;  %v2334_v23 = vld [vmem:[%s4229_s8 + $0x30] sm:$0xff]  ;;  %v2339_v29 = vld [vmem:[%s4229_s8 + $0x58] sm:$0xff] }
 0x1a3   : > { %3039 = vmatpush1.bf16.msra.mxu0 %v3038_v36  ;;  %3047 = vmatpush1.bf16.msra.mxu1 %v3046_v37  ;;  %v2776_v36 = vld [vmem:[%s4228_s7 + $0x1c8] sm:$0xff]  ;;  %v2343_v30 = vld [vmem:[%s4229_s8 + $0x78] sm:$0xff] }
 0x1a4   : > { %1450 = vmatprep.mubr.f32.mxu0 %v3238_v15  ;;  %1527 = vmatprep.mubr.f32.mxu1 %v3238_v15  ;;  %v2780_v37 = vld [vmem:[%s4228_s7 + $0x1e8] sm:$0xff] }
 0x1a5   : > { %3049 = vmatprep.subr.bf16.mxu0 %v3048_v44  ;;  %3057 = vmatprep.subr.bf16.mxu1 %v3056_v45  ;;  %v2779_v44 = vld [vmem:[%s4228_s7 + $0x1e0] sm:$0xff]  ;;  %v2777_v45 = vld [vmem:[%s4228_s7 + $0x1d0] sm:$0xff]  ;;  %v3084_v49 = vpack.c.bf16 %v2780_v37, %v2776_v36  ;;  %v2345_v37 = vld [vmem:[%s4229_s8 + $0x88] sm:$0xff] }
 0x1a6   : > { %2723 = vmatmul.mubr.msk.f32.vlgmr.msra.gmra.mrb[2].mxu0 %vm573_vm5, %v1362_v58  ;;  %2725 = vmatmul.mubr.msk.f32.vlgmr.msra.gmra.mrb[2].mxu1 %vm573_vm5, %v1362_v58  ;;  %v3086_v56 = vpack.c.bf16 %v2779_v44, %v2775_v43  ;;  %v3094_v57 = vpack.c.bf16 %v2781_v46, %v2777_v45  ;;  %v2787_v58 = vld [vmem:[%s4228_s7 + $0x200] sm:$0xff]  ;;  %v2342_v36 = vld [vmem:[%s4229_s8 + $0x70] sm:$0xff]  ;;  %v2347_v43 = vld [vmem:[%s4229_s8 + $0x98] sm:$0xff] }
 0x1a7   : > { %3051 = vmatpush1.bf16.msra.mxu0 %v3050_v52  ;;  %3059 = vmatpush1.bf16.msra.mxu1 %v3058_v53  ;;  %v2788_v52 = vld [vmem:[%s4228_s7 + $0x208] sm:$0xff]  ;;  %v2351_v44 = vld [vmem:[%s4229_s8 + $0xb8] sm:$0xff] }
 0x1a8   : > { %1456 = vmatprep.mubr.f32.mxu0 %v3238_v15  ;;  %1533 = vmatprep.mubr.f32.mxu1 %v3238_v15  ;;  %v2792_v53 = vld [vmem:[%s4228_s7 + $0x228] sm:$0xff] }
 0x1a9   : > { %3053 = vmatprep.subr.bf16.mxu0 %v3052_v59  ;;  %3061 = vmatprep.subr.bf16.mxu1 %v3060_v60  ;;  %v2791_v59 = vld [vmem:[%s4228_s7 + $0x220] sm:$0xff]  ;;  %v2789_v60 = vld [vmem:[%s4228_s7 + $0x210] sm:$0xff]  ;;  %v3096_v0 = vpack.c.bf16 %v2792_v53, %v2788_v52  ;;  %v3120_v52 = vpack.c.bf16 %v2349_v38, %v2345_v37  ;;  %v3136_v53 = vpack.c.bf16 %v2351_v44, %v2347_v43 }
 0x1aa   : > { %2724 = vmatmul.mubr.msk.f32.gmra.mrb[4].mxu0 %vm573_vm5, %v1363_v7  ;;  %2726 = vmatmul.mubr.msk.f32.gmra.mrb[4].mxu1 %vm573_vm5, %v1363_v7  ;;  %v3098_v5 = vpack.c.bf16 %v2791_v59, %v2787_v58  ;;  %v3106_v6 = vpack.c.bf16 %v2793_v61, %v2789_v60  ;;  %v2795_v7 = vld [vmem:[%s4228_s7 + $0x240] sm:$0xff]  ;;  %v2313_v58 = vpop.permute.xlu1 %2312  ;;  %v2355_v59 = vld [vmem:[%s4229_s8 + $0xd8] sm:$0xff] }
 0x1ab   : > { %3055 = vmatpush1.bf16.msra.mxu0 %v3054_v2  ;;  %3063 = vmatpush1.bf16.msra.mxu1 %v3062_v3  ;;  %v2796_v2 = vld [vmem:[%s4228_s7 + $0x248] sm:$0xff]  ;;  %v2359_v60 = vld [vmem:[%s4229_s8 + $0xf8] sm:$0xff] }
 0x1ac   : > { %1637 = vmatprep.mubr.f32.mxu0 %v3238_v15  ;;  %1714 = vmatprep.mubr.f32.mxu1 %v3238_v15  ;;  %v2800_v3 = vld [vmem:[%s4228_s7 + $0x268] sm:$0xff] }
 0x1ad   : > { %3065 = vmatprep.subr.bf16.mxu0 %v3064_v8  ;;  %3073 = vmatprep.subr.bf16.mxu1 %v3072_v9  ;;  %v2799_v8 = vld [vmem:[%s4228_s7 + $0x260] sm:$0xff]  ;;  %v2797_v9 = vld [vmem:[%s4228_s7 + $0x250] sm:$0xff]  ;;  %v3100_v12 = vpack.c.bf16 %v2800_v3, %v2796_v2  ;;  %v3140_v2 = vpack.c.bf16 %v2359_v60, %v2355_v59 }
 0x1ae   : > { %2743 = vmatmul.mubr.msk.f32.vlgmr.msra.gmra.mrb[2].mxu0 %vm573_vm5, %v1548_v20  ;;  %2745 = vmatmul.mubr.msk.f32.vlgmr.msra.gmra.mrb[2].mxu1 %vm573_vm5, %v1548_v20  ;;  %v3102_v18 = vpack.c.bf16 %v2799_v8, %v2795_v7  ;;  %v3110_v19 = vpack.c.bf16 %v2801_v10, %v2797_v9  ;;  %v2328_v20 = vld [vmem:[%s4229_s8] sm:$0xff]  ;;  %v3142_v7 = vpack.c.bf16 %v2358_v48, %v2354_v4  ;;  %v2315_v8 = vpop.permute.xlu0 %2314 }
 0x1af   : > { %3067 = vmatpush1.bf16.msra.mxu0 %v3066_v14  ;;  %3075 = vmatpush1.bf16.msra.mxu1 %v3074_v16  ;;  %v2329_v14 = vld [vmem:[%s4229_s8 + $0x8] sm:$0xff]  ;;  %v2356_v3 = vld [vmem:[%s4229_s8 + $0xe0] sm:$0xff]  ;;  %v2318_v9 = vmax.f32 %v3377_v41, %v2313_v58  ;;  %v2319_v10 = vmax.f32 %v3427_v62, %v2315_v8  ;;  %v2530_v41 = vlaneseq }
 0x1b0   : > { %1643 = vmatprep.mubr.f32.mxu0 %v3238_v15  ;;  %1720 = vmatprep.mubr.f32.mxu1 %v3238_v15  ;;  %v2333_v16 = vld [vmem:[%s4229_s8 + $0x28] sm:$0xff] }
 0x1b1   : > { %3069 = vmatprep.subr.bf16.mxu0 %v3068_v21  ;;  %3077 = vmatprep.subr.bf16.mxu1 %v3076_v22  ;;  %v2332_v21 = vld [vmem:[%s4229_s8 + $0x20] sm:$0xff]  ;;  %v2330_v22 = vld [vmem:[%s4229_s8 + $0x10] sm:$0xff]  ;;  %v3112_v25 = vpack.c.bf16 %v2333_v16, %v2329_v14  ;;  %v2531_v62 = vshrl.u32 %v2530_v41, 7 }
 0x1b2   : > { %2744 = vmatmul.mubr.msk.f32.gmra.mrb[4].mxu0 %vm573_vm5, %v1549_v33  ;;  %2746 = vmatmul.mubr.msk.f32.gmra.mrb[4].mxu1 %vm573_vm5, %v1549_v33  ;;  %v1923_v24 = vld [vmem:[#allocation3 + $0xb] sm:$0xff]  ;;  %v3114_v31 = vpack.c.bf16 %v2332_v21, %v2328_v20  ;;  %v3130_v32 = vpack.c.bf16 %v2334_v23, %v2330_v22 }
 0x1b3   : > { %3071 = vmatpush1.bf16.msra.mxu0 %v3070_v27  ;;  %3079 = vmatpush1.bf16.msra.mxu1 %v3078_v28  ;;  %v2337_v27 = vld [vmem:[%s4229_s8 + $0x48] sm:$0xff]  ;;  %v2336_v33 = vld [vmem:[%s4229_s8 + $0x40] sm:$0xff]  ;;  %v2532_v14 = vsub.s32 0, %v2531_v62  ;;  %v2540_v16 = vsub.s32 2, %v2531_v62  ;;  %v2536_v17 = vsub.s32 1, %v2531_v62 }
 0x1b4   : > { %1824 = vmatprep.mubr.f32.mxu0 %v3238_v15  ;;  %1901 = vmatprep.mubr.f32.mxu1 %v3238_v15  ;;  %v2341_v28 = vld [vmem:[%s4229_s8 + $0x68] sm:$0xff] }
 0x1b5   : > { %3081 = vmatprep.subr.bf16.mxu0 %v3080_v34  ;;  %3089 = vmatprep.subr.bf16.mxu1 %v3088_v35  ;;  %v2340_v34 = vld [vmem:[%s4229_s8 + $0x60] sm:$0xff]  ;;  %v2338_v35 = vld [vmem:[%s4229_s8 + $0x50] sm:$0xff]  ;;  %v2541_v20 = vrot.slane %v2528_v51, %v2540_v16  ;;  %v2537_v21 = vrot.slane %v2528_v51, %v2536_v17 }
 0x1b6   : > { %2763 = vmatmul.mubr.msk.f32.vlgmr.msra.gmra.mrb[2].mxu0 %vm573_vm5, %v1735_v47  ;;  %2765 = vmatmul.mubr.msk.f32.vlgmr.msra.gmra.mrb[2].mxu1 %vm573_vm5, %v1735_v47  ;;  %v3118_v45 = vpack.c.bf16 %v2340_v34, %v2336_v33  ;;  %v3134_v46 = vpack.c.bf16 %v2342_v36, %v2338_v35  ;;  %v2344_v47 = vld [vmem:[%s4229_s8 + $0x80] sm:$0xff] }
 0x1b7   : > { %3083 = vmatpush1.bf16.msra.mxu0 %v3082_v40  ;;  %3091 = vmatpush1.bf16.msra.mxu1 %v3090_v42  ;;  %v3116_v40 = vpack.c.bf16 %v2341_v28, %v2337_v27  ;;  %v3132_v42 = vpack.c.bf16 %v2343_v30, %v2339_v29 }
 0x1b8   : > { %1830 = vmatprep.mubr.f32.mxu0 %v3238_v15  ;;  %1907 = vmatprep.mubr.f32.mxu1 %v3238_v15 }
 0x1b9   : > { %3085 = vmatprep.subr.bf16.mxu0 %v3084_v49  ;;  %3093 = vmatprep.subr.bf16.mxu1 %v3092_v50  ;;  %v2348_v49 = vld [vmem:[%s4229_s8 + $0xa0] sm:$0xff]  ;;  %v2346_v50 = vld [vmem:[%s4229_s8 + $0x90] sm:$0xff] }
 0x1ba   : > { %2764 = vmatmul.mubr.msk.f32.gmra.mrb[4].mxu0 %vm573_vm5, %v1736_v63  ;;  %2766 = vmatmul.mubr.msk.f32.gmra.mrb[4].mxu1 %vm573_vm5, %v1736_v63  ;;  %v3122_v61 = vpack.c.bf16 %v2348_v49, %v2344_v47  ;;  %v3138_v63 = vpack.c.bf16 %v2350_v54, %v2346_v50 }
 0x1bb   : > { %3087 = vmatpush1.bf16.msra.mxu0 %v3086_v56  ;;  %3095 = vmatpush1.bf16.msra.mxu1 %v3094_v57  ;;  %v2357_v56 = vld [vmem:[%s4229_s8 + $0xe8] sm:$0xff] }
 0x1bc   : > { %2011 = vmatprep.mubr.f32.mxu0 %v3238_v15  ;;  %2088 = vmatprep.mubr.f32.mxu1 %v3238_v15  ;;  %v2110_v57 = vld [vmem:[#allocation3 + $0xc] sm:$0xff] }
 0x1bd   : > { %3097 = vmatprep.subr.bf16.mxu0 %v3096_v0  ;;  %3105 = vmatprep.subr.bf16.mxu1 %v3104_v1  ;;  %v2352_v0 = vld [vmem:[%s4229_s8 + $0xc0] sm:$0xff]  ;;  %v3124_v1 = vpack.c.bf16 %v2357_v56, %v2353_v55 }
 0x1be   : > { %2783 = vmatmul.mubr.msk.f32.vlgmr.msra.gmra.mrb[2].mxu0 %vm573_vm5, %v1922_v11  ;;  %2785 = vmatmul.mubr.msk.f32.vlgmr.msra.gmra.mrb[2].mxu1 %vm573_vm5, %v1922_v11 }
 0x1bf   : > { %3099 = vmatpush1.bf16.msra.mxu0 %v3098_v5  ;;  %3107 = vmatpush1.bf16.msra.mxu1 %v3106_v6  ;;  %v2321_v5 = vpop.permute.xlu1 %2320  ;;  %v3126_v6 = vpack.c.bf16 %v2356_v3, %v2352_v0 }
 0x1c0   : > { %2017 = vmatprep.mubr.f32.mxu0 %v3238_v15  ;;  %2094 = vmatprep.mubr.f32.mxu1 %v3238_v15 }
 0x1c1   : > { %3101 = vmatprep.subr.bf16.mxu0 %v3100_v12  ;;  %3109 = vmatprep.subr.bf16.mxu1 %v3108_v13  ;;  %v2326_v12 = vmax.f32 %v2318_v9, %v2321_v5 }
 0x1c2   : > { %2784 = vmatmul.mubr.msk.f32.gmra.mrb[4].mxu0 %vm573_vm5, %v1923_v24  ;;  %2786 = vmatmul.mubr.msk.f32.gmra.mrb[4].mxu1 %vm573_vm5, %v1923_v24 }
 0x1c3   : > { %3103 = vmatpush1.bf16.msra.mxu0 %v3102_v18  ;;  %3111 = vmatpush1.bf16.msra.mxu1 %v3110_v19  ;;  %v2323_v11 = vpop.permute.xlu1 %2322  ;;  %v2544_v18 = vsub.s32 3, %v2531_v62  ;;  %v2533_v19 = vrot.slane %v2528_v51, %v2532_v14 }
 0x1c4   : > { %2198 = vmatprep.mubr.f32.mxu0 %v3238_v15  ;;  %2275 = vmatprep.mubr.f32.mxu1 %v3238_v15  ;;  %v2327_v13 = vmax.f32 %v2319_v10, %v2323_v11 }
 0x1c5   : > { %3113 = vmatprep.subr.bf16.mxu0 %v3112_v25  ;;  %3129 = vmatprep.subr.bf16.mxu1 %v3128_v26  ;;  %v2545_v22 = vrot.slane %v2528_v51, %v2544_v18 }
 0x1c6   : > { %2803 = vmatmul.mubr.msk.f32.vlgmr.msra.gmra.mrb[2].mxu0 %vm573_vm5, %v2109_v39  ;;  %2805 = vmatmul.mubr.msk.f32.vlgmr.msra.gmra.mrb[2].mxu1 %vm573_vm5, %v2109_v39 }
 0x1c7   : > { %3115 = vmatpush1.bf16.msra.mxu0 %v3114_v31  ;;  %3131 = vmatpush1.bf16.msra.mxu1 %v3130_v32 }
 0x1c8   : > { %2204 = vmatprep.mubr.f32.mxu0 %v3238_v15  ;;  %2281 = vmatprep.mubr.f32.mxu1 %v3238_v15 }
 0x1c9   : > { %3117 = vmatprep.subr.bf16.mxu0 %v3116_v40  ;;  %3133 = vmatprep.subr.bf16.mxu1 %v3132_v42 }
 0x1ca   : > { %2804 = vmatmul.mubr.msk.f32.gmra.mrb[4].mxu0 %vm573_vm5, %v2110_v57  ;;  %2806 = vmatmul.mubr.msk.f32.gmra.mrb[4].mxu1 %vm573_vm5, %v2110_v57 }
 0x1cb   : > { %3119 = vmatpush1.bf16.msra.mxu0 %v3118_v45  ;;  %3135 = vmatpush1.bf16.msra.mxu1 %v3134_v46 }
 0x1cc   : > { %3121 = vmatprep.subr.bf16.mxu0 %v3120_v52  ;;  %3137 = vmatprep.subr.bf16.mxu1 %v3136_v53 }
 0x1cd   : > { %2430 = vmatprep.mubr.f32.mxu0 %v3238_v15  ;;  %2507 = vmatprep.mubr.f32.mxu1 %v3238_v15 }
 0x1cf   : > { %3123 = vmatpush1.bf16.msra.mxu0 %v3122_v61  ;;  %3139 = vmatpush1.bf16.msra.mxu1 %v3138_v63 }
 0x1d0   : > { %3125 = vmatprep.subr.bf16.mxu0 %v3124_v1  ;;  %3141 = vmatprep.subr.bf16.mxu1 %v3140_v2 }
 0x1d3   : > { %3127 = vmatpush1.bf16.msra.mxu0 %v3126_v6  ;;  %3143 = vmatpush1.bf16.msra.mxu1 %v3142_v7 }
 0x1d6   : > { %2807 = vmatmul.mubr.msk.f32.vlgmr.msra.gmra.mrb[2].mxu0 %vm391_vm2, %v2326_v12  ;;  %2809 = vmatmul.mubr.msk.f32.vlgmr.msra.gmra.mrb[2].mxu1 %vm391_vm2, %v2326_v12 }
 0x1d7   : > { %2436 = vmatprep.mubr.f32.mxu0 %v3238_v15  ;;  %2513 = vmatprep.mubr.f32.mxu1 %v3238_v15 }
 0x1da   : > { %2808 = vmatmul.mubr.msk.f32.gmra.mrb[4].mxu0 %vm391_vm2, %v2327_v13  ;;  %2810 = vmatmul.mubr.msk.f32.gmra.mrb[4].mxu1 %vm391_vm2, %v2327_v13 }
 0x2a9   : > { %v2432_v15 = vpop.f32.mrb[2].mxu0  ;;  %v2509_v23 = vpop.f32.mrb[2].mxu1 }
 0x2aa   : > { %v2550_v24 = vadd.f32 %v2533_v19, %v2432_v15  ;;  %v2552_v25 = vadd.f32 %v2541_v20, %v2509_v23  ;;  %v2434_v26 = vpop.f32.mrb[3].mxu0  ;;  %v2511_v27 = vpop.f32.mrb[3].mxu1 }
 0x2ab   : > { %v2551_v28 = vadd.f32 %v2537_v21, %v2434_v26  ;;  %v2553_v29 = vadd.f32 %v2545_v22, %v2511_v27 }
 0x2ac   : > { %v2558_v30 = vmax.f32 %v2550_v24, 0.0  ;;  %v2560_v31 = vmax.f32 %v2552_v25, 0.0 }
 0x2ad   : > { %v2559_v32 = vmax.f32 %v2551_v28, 0.0  ;;  %v2561_v33 = vmax.f32 %v2553_v29, 0.0  ;;  %v2438_v34 = vpop.f32.mrb[4].mxu0  ;;  %v2515_v35 = vpop.f32.mrb[4].mxu1 }
 0x2ae   : > { %2566 = vst [vmem:[%s359_s19] sm:$0xff] %v2558_v30  ;;  %2568 = vst [vmem:[%s359_s19 + $0x10] sm:$0xff] %v2560_v31  ;;  %v2554_v36 = vadd.f32 %v2533_v19, %v2438_v34  ;;  %v2556_v37 = vadd.f32 %v2541_v20, %v2515_v35  ;;  %v2440_v38 = vpop.f32.mrb[5].mxu0  ;;  %v2517_v39 = vpop.f32.mrb[5].mxu1 }
 0x2af   : > { %2567 = vst [vmem:[%s359_s19 + $0x8] sm:$0xff] %v2559_v32  ;;  %2569 = vst [vmem:[%s359_s19 + $0x18] sm:$0xff] %v2561_v33  ;;  %v2555_v40 = vadd.f32 %v2537_v21, %v2440_v38  ;;  %v2557_v42 = vadd.f32 %v2545_v22, %v2517_v39 }
 0x2b0   : > { %v2562_v43 = vmax.f32 %v2554_v36, 0.0  ;;  %v2564_v44 = vmax.f32 %v2556_v37, 0.0 }
 0x2b1   : > { %v2563_v45 = vmax.f32 %v2555_v40, 0.0  ;;  %v2565_v46 = vmax.f32 %v2557_v42, 0.0 }
 0x2b2   : > { %2570 = vst [vmem:[%s359_s19 + $0x20] sm:$0xff] %v2562_v43  ;;  %2572 = vst [vmem:[%s359_s19 + $0x30] sm:$0xff] %v2564_v44 }
 0x2b3   : > { %2571 = vst [vmem:[%s359_s19 + $0x28] sm:$0xff] %v2563_v45  ;;  %2573 = vst [vmem:[%s359_s19 + $0x38] sm:$0xff] %v2565_v46 }
 0x2b4 PF: > { %s20_s13 = sadd.s32 1, %s3234_s13  }
 0x2b5   : > { %p17_p4 = scmp.ge.s32.totalorder %s20_s13, 4  }
 0x2b7   :  { %19 = sbr.rel (!%p17_p4) target bundleno = 1 (0x1), region = 96 }

</bundles_post_ra>
